<compile_context>
chip_gen: v5e
topology: v5e:2x2
jax: 0.10.0
libtpu: 0.0.40
codegen_flags: <defaults>
</compile_context>

<pallas_src>
import math

import jax
import jax.numpy as jnp
from jax.experimental import pallas as pl
from jax.experimental.pallas import tpu as pltpu

Config = {
    "Size": (32, 32),
    "Classes": ("c0", "c1", "c2", "c3"),
    "Anchors": [0.04, 0.05, 0.07, 0.06, 0.10, 0.09,
                0.09, 0.10, 0.12, 0.14, 0.16, 0.15,
                0.15, 0.18, 0.22, 0.20, 0.28, 0.30],
}

_OBJ_LANE = 512               # lane-dense width for the objectness logits
_OBJ_CORES = 2                # shard obj reduction over 2 TCs (v7x); harmless on 1-TC chips
_OBJ_TARGET_BLOCK_ROWS = 512  # ~1 MB per grid step at 512 lanes f32


def smooth_BCE(eps=0.1):
    return 1.0 - 0.5 * eps, 0.5 * eps


def _round_up(x, m):
    return ((x + m - 1) // m) * m


def _ceil_div(a, b):
    return -(-a // b)


def _pad_rows(x, rows):
    return jnp.pad(x, ((0, rows - x.shape[0]), (0, 0)))


# ---------------------------------------------------------------------------
# In-kernel math helpers
# ---------------------------------------------------------------------------
def _atan_pos(x):
    """Cephes-style arctan for x >= 0 (float32, ~1e-7 abs error)."""
    t3 = 2.414213562373095    # tan(3*pi/8)
    t1 = 0.4142135623730951   # tan(pi/8)
    big = x > t3
    mid = jnp.logical_and(x > t1, jnp.logical_not(big))
    y0 = jnp.where(big, math.pi / 2.0, jnp.where(mid, math.pi / 4.0, 0.0))
    xr = jnp.where(big, -1.0 / jnp.maximum(x, 1e-12),
                   jnp.where(mid, (x - 1.0) / (x + 1.0), x))
    z = xr * xr
    p = ((((8.05374449538e-2 * z - 1.38776856032e-1) * z
           + 1.99777106478e-1) * z - 3.33329491539e-1) * z * xr + xr)
    return y0 + p


def _bce_with_logits(x, t):
    # numerically stable BCEWithLogitsLoss (pos_weight == 1.0), elementwise
    return jnp.maximum(x, 0.0) - x * t + jnp.log(1.0 + jnp.exp(-jnp.abs(x)))


# ---------------------------------------------------------------------------
# Matched-target kernel (all levels, one packed, 8-row-aligned slab)
# ---------------------------------------------------------------------------
def _make_target_kernel(nc, cls_rows, n_per_level, nl, gr):
    o_cls = 8                     # class logits section
    o_box = 8 + cls_rows          # tbox (4 rows) + anchors (2 rows)
    o_ct = o_box + 8              # smoothed class targets
    o_mk = o_ct + cls_rows        # row 0: valid mask, row 1: dedup (last-write) mask

    def kernel(slab_ref, stats_ref):
        slab = slab_ref[...]
        n_lanes = slab.shape[1]

        pxy_l = slab[0:2, :]
        pwh_l = slab[2:4, :]
        pobj = slab[4:5, :]
        pcls = slab[o_cls:o_cls + nc, :]
        tb = slab[o_box:o_box + 4, :]
        an = slab[o_box + 4:o_box + 6, :]
        ct = slab[o_ct:o_ct + nc, :]
        mk = slab[o_mk:o_mk + 1, :]
        dmk = slab[o_mk + 1:o_mk + 2, :]

        eps = 1e-7
        pxy = jax.nn.sigmoid(pxy_l) * 2.0 - 0.5
        pwh = (jax.nn.sigmoid(pwh_l) * 2.0) ** 2 * an

        # bbox_iou(pbox.T, tbox, x1y1x2y2=False, CIoU=True)
        b1_x1 = pxy[0:1, :] - pwh[0:1, :] * 0.5
        b1_x2 = pxy[0:1, :] + pwh[0:1, :] * 0.5
        b1_y1 = pxy[1:2, :] - pwh[1:2, :] * 0.5
        b1_y2 = pxy[1:2, :] + pwh[1:2, :] * 0.5
        b2_x1 = tb[0:1, :] - tb[2:3, :] * 0.5
        b2_x2 = tb[0:1, :] + tb[2:3, :] * 0.5
        b2_y1 = tb[1:2, :] - tb[3:4, :] * 0.5
        b2_y2 = tb[1:2, :] + tb[3:4, :] * 0.5

        inter = (jnp.maximum(jnp.minimum(b1_x2, b2_x2)
                             - jnp.maximum(b1_x1, b2_x1), 0.0)
                 * jnp.maximum(jnp.minimum(b1_y2, b2_y2)
                               - jnp.maximum(b1_y1, b2_y1), 0.0))
        w1 = b1_x2 - b1_x1
        h1 = b1_y2 - b1_y1 + eps
        w2 = b2_x2 - b2_x1
        h2 = b2_y2 - b2_y1 + eps
        union = w1 * h1 + w2 * h2 - inter + eps
        iou = inter / union

        cw = jnp.maximum(b1_x2, b2_x2) - jnp.minimum(b1_x1, b2_x1)
        ch = jnp.maximum(b1_y2, b2_y2) - jnp.minimum(b1_y1, b2_y1)
        c2 = cw * cw + ch * ch + eps
        rho2 = ((b2_x1 + b2_x2 - b1_x1 - b1_x2) ** 2
                + (b2_y1 + b2_y2 - b1_y1 - b1_y2) ** 2) * 0.25
        v = (4.0 / (math.pi ** 2)) * (_atan_pos(w2 / h2) - _atan_pos(w1 / h1)) ** 2
        alpha = v / (v - iou + (1.0 + eps))
        ciou = iou - (rho2 / c2 + v * alpha)                        # (1, N)

        # sparse objectness correction:  BCE(x, t) - BCE(x, 0) == -x * t
        tobj_val = (1.0 - gr) + gr * jnp.maximum(ciou, 0.0)
        corr = dmk * (-pobj) * tobj_val                             # (1, N)

        cls_bce = _bce_with_logits(pcls, ct)                        # (nc, N)
        cls_sum = jnp.sum(cls_bce, axis=0, keepdims=True)           # (1, N)

        # per-level sums via one MXU matmul against a level-indicator matrix:
        #   stats row 0 -> lbox, 1 -> lcls, 2 -> count, 3 -> lobj correction
        vals = jnp.concatenate(
            [(1.0 - ciou) * mk, cls_sum * mk, mk, corr,
             jnp.zeros((4, n_lanes), jnp.float32)], axis=0)         # (8, N)

        cand = jax.lax.broadcasted_iota(jnp.int32, (n_lanes, 128), 0)
        col = jax.lax.broadcasted_iota(jnp.int32, (n_lanes, 128), 1)
        ind = jnp.zeros((n_lanes, 128), jnp.float32)
        for l in range(nl):
            hit = ((cand >= l * n_per_level) & (cand < (l + 1) * n_per_level)
                   & (col == l))
            ind = jnp.where(hit, 1.0, ind)

        stats_ref[...] = jnp.dot(vals, ind, preferred_element_type=jnp.float32)

    return kernel


def target_loss_pallas(slab, nc, cls_rows, n_per_level, nl, gr):
    rows, n_lanes = slab.shape
    slab_bytes = rows * n_lanes * 4
    ind_bytes = n_lanes * 128 * 4
    vmem = int(max(4 << 20, 2 * slab_bytes + 2 * ind_bytes + (1 << 20)))
    kernel = _make_target_kernel(nc, cls_rows, n_per_level, nl, gr)
    return pl.pallas_call(
        kernel,
        grid=(1,),
        in_specs=[pl.BlockSpec((rows, n_lanes), lambda i: (0, 0))],
        out_specs=pl.BlockSpec((8, 128), lambda i: (0, 0)),
        out_shape=jax.ShapeDtypeStruct((8, 128), jnp.float32),
        compiler_params=pltpu.CompilerParams(
            dimension_semantics=("arbitrary",),
            vmem_limit_bytes=vmem),
    )(slab)


# ---------------------------------------------------------------------------
# Objectness BCE(x, 0) reduction (logits only, per-row level weights,
# 2-way "parallel" split for v7x megacore)
# ---------------------------------------------------------------------------
def _make_obj_kernel(block_rows, n_blocks_per_core, row_bounds, weights):
    nl = len(weights)

    def kernel(x_ref, out_ref):
        c = pl.program_id(0)
        i = pl.program_id(1)

        @pl.when(i == 0)
        def _():
            out_ref[...] = jnp.zeros_like(out_ref)

        # per-row level weight (balance / element count) from static row bounds
        row0 = (c * n_blocks_per_core + i) * block_rows
        row_idx = row0 + jax.lax.broadcasted_iota(jnp.int32, (block_rows, 1), 0)
        w = jnp.full((block_rows, 1), weights[nl - 1], jnp.float32)
        for l in range(nl - 2, -1, -1):
            w = jnp.where(row_idx < row_bounds[l], jnp.float32(weights[l]), w)

        x = x_ref[...]
        # BCE(x, 0) = softplus(x); pad logits are -1e4 -> contribute exactly 0
        bce0 = jnp.maximum(x, 0.0) + jnp.log(1.0 + jnp.exp(-jnp.abs(x)))
        row_sums = jnp.sum(bce0, axis=1, keepdims=True)             # (block_rows, 1)
        ssum = jnp.sum(row_sums * w, axis=0, keepdims=True)         # (1, 1)

        r8 = jax.lax.broadcasted_iota(jnp.int32, (8, 128), 0)
        c8 = jax.lax.broadcasted_iota(jnp.int32, (8, 128), 1)
        out_ref[...] += jnp.where((r8 == 0) & (c8 == 0), ssum, 0.0)

    return kernel


def obj_bce_pallas(logits2d, block_rows, n_blocks_per_core, num_cores,
                   row_bounds, weights):
    rows, lane = logits2d.shape
    block_bytes = block_rows * lane * 4
    vmem = int(max(4 << 20, 3 * block_bytes + (1 << 20)))
    kernel = _make_obj_kernel(block_rows, n_blocks_per_core,
                              tuple(int(b) for b in row_bounds),
                              tuple(float(w) for w in weights))
    out = pl.pallas_call(
        kernel,
        grid=(num_cores, n_blocks_per_core),
        in_specs=[pl.BlockSpec(
            (block_rows, lane),
            lambda c, i: (c * n_blocks_per_core + i, 0))],
        out_specs=pl.BlockSpec((8, 128), lambda c, i: (c, 0)),
        out_shape=jax.ShapeDtypeStruct((num_cores * 8, 128), jnp.float32),
        compiler_params=pltpu.CompilerParams(
            dimension_semantics=("parallel", "arbitrary"),
            vmem_limit_bytes=vmem),
    )(logits2d)
    return jnp.sum(out)   # only [8c, 0] entries are non-zero


# ---------------------------------------------------------------------------
# Plain-JAX glue: last-write-wins dedup of duplicate (b, a, gj, gi) candidates
# ---------------------------------------------------------------------------
def _dedup_keep_last(b, a, gj, gi, valid, B, A, H, W):
    n = b.shape[0]
    cell = ((b * A + a) * H + gj) * W + gi
    sentinel = B * A * H * W + jnp.arange(n, dtype=jnp.int32)   # unique, never dedups
    key = jnp.where(valid, cell, sentinel)
    order = jnp.argsort(key, stable=True)        # ties keep original (write) order
    sk = key[order]
    last = jnp.concatenate([sk[:-1] != sk[1:], jnp.ones((1,), dtype=bool)])
    keep = jnp.zeros((n,), dtype=bool).at[order].set(last)
    return valid & keep


# ---------------------------------------------------------------------------
# YOLOv3 loss module (JAX / Pallas)
# ---------------------------------------------------------------------------
class YOLOv3LossPallas:
    def __init__(self):
        self.size = Config["Size"][0]
        self.num_classes = len(Config["Classes"])
        self.anchors = (jnp.asarray(Config["Anchors"], jnp.float32)
                        .reshape(3, 3, 2) * self.size)
        self.nl = self.anchors.shape[0]
        self.anchor_t = 4.0
        self.gr = 1.0
        self.cp, self.cn = smooth_BCE()
        self.balance = [4.0, 1.0, 0.4]
        self.box_loss = 0.05
        self.cls_loss = 0.5
        self.obj_loss = 1.0

    # ---- target assignment (plain-JAX glue, fixed-size masked candidates) ----
    def build_t(self, pred, targets):
        c1 = pred[0]
        _, na, _, _, _ = c1.shape
        nt = targets.shape[0]

        # b_box_to_c_box: corner (x1,y1,x2,y2) -> center (cx,cy,w,h)
        xyxy = targets[:, 2:]
        cxywh = jnp.concatenate([(xyxy[:, 0:2] + xyxy[:, 2:4]) * 0.5,
                                 xyxy[:, 2:4] - xyxy[:, 0:2]], axis=1)
        targets = jnp.concatenate([targets[:, :2], cxywh], axis=1)

        ai = jnp.tile(jnp.arange(na, dtype=jnp.float32)[:, None], (1, nt))
        t_all = jnp.concatenate(
            [jnp.tile(targets[None], (na, 1, 1)), ai[:, :, None]], axis=2)  # (na,nt,7)

        g = 0.5
        off = jnp.array([[0., 0.], [1., 0.], [0., 1.], [-1., 0.], [0., -1.]],
                        jnp.float32) * g

        tcls, tbox, indices, anch, masks = [], [], [], [], []
        for i in range(self.nl):
            anchors = self.anchors[i]                              # (3, 2)
            H, W = pred[i].shape[2], pred[i].shape[3]
            gain = jnp.array([1., 1., W, H, W, H, 1.], jnp.float32)
            t = t_all * gain                                       # (na, nt, 7)
            r = t[:, :, 4:6] / anchors[:, None, :]
            keep = jnp.max(jnp.maximum(r, 1.0 / r), axis=2) < self.anchor_t

            t2 = t.reshape(na * nt, 7)
            keep2 = keep.reshape(na * nt)
            gxy = t2[:, 2:4]
            gxi = jnp.array([W, H], jnp.float32) - gxy
            jm = (gxy[:, 0] % 1.0 < g) & (gxy[:, 0] > 1.0)
            km = (gxy[:, 1] % 1.0 < g) & (gxy[:, 1] > 1.0)
            lm = (gxi[:, 0] % 1.0 < g) & (gxi[:, 0] > 1.0)
            mm = (gxi[:, 1] % 1.0 < g) & (gxi[:, 1] > 1.0)
            off_mask = jnp.stack([jnp.ones_like(jm), jm, km, lm, mm])     # (5, na*nt)
            valid = (off_mask & keep2[None, :]).reshape(-1)               # (5*na*nt,)

            t5 = jnp.broadcast_to(t2[None], (5, na * nt, 7)).reshape(-1, 7)
            offs = jnp.broadcast_to(off[:, None, :], (5, na * nt, 2)).reshape(-1, 2)

            b = t5[:, 0].astype(jnp.int32)
            c = t5[:, 1].astype(jnp.int32)
            gxy5 = t5[:, 2:4]
            gwh = t5[:, 4:6]
            gij = jnp.floor(gxy5 - offs).astype(jnp.int32)
            gi = jnp.clip(gij[:, 0], 0, W - 1)
            gj = jnp.clip(gij[:, 1], 0, H - 1)
            a = t5[:, 6].astype(jnp.int32)

            indices.append((b, a, gj, gi))
            gij_c = jnp.stack([gi, gj], axis=1).astype(jnp.float32)
            tbox.append(jnp.concatenate([gxy5 - gij_c, gwh], axis=1))     # (N, 4)
            anch.append(anchors[a])                                       # (N, 2)
            tcls.append(c)
            masks.append(valid)
        return tcls, tbox, indices, anch, masks

    # ---- forward ----
    def __call__(self, pred, targets):
        nc = self.num_classes
        cls_rows = _round_up(max(nc, 1), 8)
        tcls, tbox, indices, anch, masks = self.build_t(pred, targets)

        # ---- matched-target slab (8-row-aligned sections, 128-lane aligned) ----
        slabs = []
        for i, pi in enumerate(pred):
            B, A, H, W, _ = pi.shape
            b, a, gj, gi = indices[i]
            valid = masks[i]
            ps = pi[b, a, gj, gi].astype(jnp.float32)              # (N, 5+nc) gather (glue)
            onehot = tcls[i][:, None] == jnp.arange(nc)[None, :]
            clst = jnp.where(onehot, self.cp, self.cn).astype(jnp.float32)
            dedup = _dedup_keep_last(b, a, gj, gi, valid, B, A, H, W)

            psT = ps.T
            sec0 = _pad_rows(psT[:5], 8)                           # xy, wh, obj logits
            sec1 = _pad_rows(psT[5:], cls_rows)                    # class logits
            sec2 = _pad_rows(jnp.concatenate(
                [tbox[i].T.astype(jnp.float32),
                 anch[i].T.astype(jnp.float32)], axis=0), 8)       # tbox + anchors
            sec3 = _pad_rows(clst.T, cls_rows)                     # smoothed class tgts
            sec4 = _pad_rows(jnp.stack(
                [valid.astype(jnp.float32),
                 dedup.astype(jnp.float32)], axis=0), 8)           # masks
            slabs.append(jnp.concatenate([sec0, sec1, sec2, sec3, sec4], axis=0))

        n_per_level = slabs[0].shape[1]
        slab = jnp.concatenate(slabs, axis=1)                      # (rows, nl*N)
        n_lanes = _round_up(max(self.nl * n_per_level, 128), 128)
        slab = jnp.pad(slab, ((0, 0), (0, n_lanes - self.nl * n_per_level)))

        stats = target_loss_pallas(slab, nc, cls_rows, n_per_level, self.nl, self.gr)

        lbox = jnp.zeros((), jnp.float32)
        lcls = jnp.zeros((), jnp.float32)
        for l in range(self.nl):
            n_l = stats[2, l]
            has_t = n_l > 0
            lbox = lbox + jnp.where(has_t, stats[0, l] / jnp.maximum(n_l, 1.0), 0.0)
            if nc > 1:
                lcls = lcls + jnp.where(
                    has_t, stats[1, l] / jnp.maximum(n_l * nc, 1.0), 0.0)

        # ---- objectness path: BCE(x,0) reduction on logits only ----
        parts, row_bounds, weights = [], [], []
        rows_acc = 0
        for i, pi in enumerate(pred):
            B, A, H, W, _ = pi.shape
            count = B * A * H * W
            rows_l = _round_up(_ceil_div(count, _OBJ_LANE), 8)     # pad to 8 rows only
            pad = rows_l * _OBJ_LANE - count
            parts.append(pi[..., 4].reshape(-1).astype(jnp.float32))
            if pad:
                # pad logit = -1e4  =>  BCE(pad, 0) == 0 exactly, no masking needed
                parts.append(jnp.full((pad,), -1e4, jnp.float32))
            rows_acc += rows_l
            row_bounds.append(rows_acc)
            weights.append(self.balance[i] / float(count))

        n_blocks_per_core = max(
            1, _ceil_div(rows_acc, _OBJ_CORES * _OBJ_TARGET_BLOCK_ROWS))
        block_rows = _round_up(
            _ceil_div(rows_acc, _OBJ_CORES * n_blocks_per_core), 8)
        rows_padded = _OBJ_CORES * n_blocks_per_core * block_rows
        final_pad = (rows_padded - rows_acc) * _OBJ_LANE
        if final_pad:
            parts.append(jnp.full((final_pad,), -1e4, jnp.float32))
        logits2d = jnp.concatenate(parts).reshape(rows_padded, _OBJ_LANE)

        lobj = obj_bce_pallas(logits2d, block_rows, n_blocks_per_core,
                              _OBJ_CORES, row_bounds, weights)
        # sparse correction: sum_l w_l * sum_{deduped matched cells} (BCE(x,t)-BCE(x,0))
        for l in range(self.nl):
            lobj = lobj + jnp.float32(weights[l]) * stats[3, l]

        lbox = lbox * self.box_loss
        lobj = lobj * self.obj_loss
        lcls = lcls * self.cls_loss
        loss = (lbox + lobj + lcls)[None]
        items = jnp.stack([lbox, lobj, lcls])
        return loss, items


if __name__ == "__main__":
    key = jax.random.PRNGKey(0)
    keys = jax.random.split(key, 8)

    B = 2
    na = 3
    nc = len(Config["Classes"])
    no = 5 + nc
    grids = [(8, 8), (4, 4), (2, 2)]

    pred = tuple(
        0.1 * jax.random.normal(keys[i], (B, na, h, w, no), jnp.float32)
        for i, (h, w) in enumerate(grids))

    nt = 6
    img = jax.random.randint(keys[3], (nt,), 0, B).astype(jnp.float32)
    cls = jax.random.randint(keys[4], (nt,), 0, nc).astype(jnp.float32)
    xy1 = jax.random.uniform(keys[5], (nt, 2), minval=0.10, maxval=0.55)
    wh = jax.random.uniform(keys[6], (nt, 2), minval=0.12, maxval=0.30)
    xy2 = jnp.clip(xy1 + wh, 0.0, 0.98)
    targets = jnp.concatenate(
        [img[:, None], cls[:, None], xy1, xy2], axis=1).astype(jnp.float32)

    loss_fn = YOLOv3LossPallas()
    loss, items = loss_fn(pred, targets)
    loss = jax.block_until_ready(loss)
    items = jax.block_until_ready(items)

    assert loss.shape == (1,) and items.shape == (3,)
    assert bool(jnp.isfinite(loss).all()) and bool(jnp.isfinite(items).all())
    print("KERNEL_OK")
</pallas_src>

<mosaic_0001>
module attributes {stable_mosaic.version = 11 : i64} {
  func.func @kernel(%arg0: i32, %arg1: memref<40x384xf32, #tpu.memory_space<vmem>>, %arg2: memref<8x128xf32, #tpu.memory_space<vmem>>) attributes {dimension_semantics = [#tpu.dimension_semantics<arbitrary>], iteration_bounds = array<i64: 1>, scalar_prefetch = 0 : i64, scratch_operands = 0 : i64, tpu.core_type = #tpu.core_type<tc>, window_params = [{pipeline_mode = #tpu.pipeline_mode<synchronous>, transform_indices = @transform_0, window_bounds = array<i64: 40, 384>}, {pipeline_mode = #tpu.pipeline_mode<synchronous>, transform_indices = @transform_1, window_bounds = array<i64: 8, 128>}]} {
    %c0 = arith.constant 0 : index
    %c0_0 = arith.constant 0 : index
    %0 = vector.load %arg1[%c0, %c0_0] : memref<40x384xf32, #tpu.memory_space<vmem>>, vector<40x384xf32>
    %1 = vector.extract_strided_slice %0 {offsets = [0, 0], sizes = [2, 384], strides = [1, 1]} : vector<40x384xf32> to vector<2x384xf32>
    %2 = vector.extract_strided_slice %0 {offsets = [2, 0], sizes = [2, 384], strides = [1, 1]} : vector<40x384xf32> to vector<2x384xf32>
    %3 = vector.extract_strided_slice %0 {offsets = [4, 0], sizes = [1, 384], strides = [1, 1]} : vector<40x384xf32> to vector<1x384xf32>
    %4 = vector.extract_strided_slice %0 {offsets = [8, 0], sizes = [4, 384], strides = [1, 1]} : vector<40x384xf32> to vector<4x384xf32>
    %5 = vector.extract_strided_slice %0 {offsets = [16, 0], sizes = [4, 384], strides = [1, 1]} : vector<40x384xf32> to vector<4x384xf32>
    %6 = vector.extract_strided_slice %0 {offsets = [20, 0], sizes = [2, 384], strides = [1, 1]} : vector<40x384xf32> to vector<2x384xf32>
    %7 = vector.extract_strided_slice %0 {offsets = [24, 0], sizes = [4, 384], strides = [1, 1]} : vector<40x384xf32> to vector<4x384xf32>
    %8 = vector.extract_strided_slice %0 {offsets = [32, 0], sizes = [1, 384], strides = [1, 1]} : vector<40x384xf32> to vector<1x384xf32>
    %9 = vector.extract_strided_slice %0 {offsets = [33, 0], sizes = [1, 384], strides = [1, 1]} : vector<40x384xf32> to vector<1x384xf32>
    %10 = arith.negf %1 : vector<2x384xf32>
    %11 = math.exp %10 : vector<2x384xf32>
    %cst = arith.constant 1.000000e+00 : f32
    %12 = vector.broadcast %cst : f32 to vector<2x384xf32>
    %13 = arith.addf %12, %11 : vector<2x384xf32>
    %14 = arith.divf %12, %13 : vector<2x384xf32>
    %cst_1 = arith.constant 2.000000e+00 : f32
    %15 = vector.broadcast %cst_1 : f32 to vector<2x384xf32>
    %16 = arith.mulf %14, %15 : vector<2x384xf32>
    %cst_2 = arith.constant 5.000000e-01 : f32
    %17 = vector.broadcast %cst_2 : f32 to vector<2x384xf32>
    %18 = arith.subf %16, %17 : vector<2x384xf32>
    %19 = arith.negf %2 : vector<2x384xf32>
    %20 = math.exp %19 : vector<2x384xf32>
    %cst_3 = arith.constant 1.000000e+00 : f32
    %21 = vector.broadcast %cst_3 : f32 to vector<2x384xf32>
    %22 = arith.addf %21, %20 : vector<2x384xf32>
    %23 = arith.divf %21, %22 : vector<2x384xf32>
    %cst_4 = arith.constant 2.000000e+00 : f32
    %24 = vector.broadcast %cst_4 : f32 to vector<2x384xf32>
    %25 = arith.mulf %23, %24 : vector<2x384xf32>
    %26 = arith.mulf %25, %25 : vector<2x384xf32>
    %27 = arith.mulf %26, %6 : vector<2x384xf32>
    %28 = vector.extract_strided_slice %18 {offsets = [0, 0], sizes = [1, 384], strides = [1, 1]} : vector<2x384xf32> to vector<1x384xf32>
    %29 = vector.extract_strided_slice %27 {offsets = [0, 0], sizes = [1, 384], strides = [1, 1]} : vector<2x384xf32> to vector<1x384xf32>
    %cst_5 = arith.constant 5.000000e-01 : f32
    %30 = vector.broadcast %cst_5 : f32 to vector<1x384xf32>
    %31 = arith.mulf %29, %30 : vector<1x384xf32>
    %32 = arith.subf %28, %31 : vector<1x384xf32>
    %33 = vector.extract_strided_slice %18 {offsets = [0, 0], sizes = [1, 384], strides = [1, 1]} : vector<2x384xf32> to vector<1x384xf32>
    %34 = vector.extract_strided_slice %27 {offsets = [0, 0], sizes = [1, 384], strides = [1, 1]} : vector<2x384xf32> to vector<1x384xf32>
    %cst_6 = arith.constant 5.000000e-01 : f32
    %35 = vector.broadcast %cst_6 : f32 to vector<1x384xf32>
    %36 = arith.mulf %34, %35 : vector<1x384xf32>
    %37 = arith.addf %33, %36 : vector<1x384xf32>
    %38 = vector.extract_strided_slice %18 {offsets = [1, 0], sizes = [1, 384], strides = [1, 1]} : vector<2x384xf32> to vector<1x384xf32>
    %39 = vector.extract_strided_slice %27 {offsets = [1, 0], sizes = [1, 384], strides = [1, 1]} : vector<2x384xf32> to vector<1x384xf32>
    %cst_7 = arith.constant 5.000000e-01 : f32
    %40 = vector.broadcast %cst_7 : f32 to vector<1x384xf32>
    %41 = arith.mulf %39, %40 : vector<1x384xf32>
    %42 = arith.subf %38, %41 : vector<1x384xf32>
    %43 = vector.extract_strided_slice %18 {offsets = [1, 0], sizes = [1, 384], strides = [1, 1]} : vector<2x384xf32> to vector<1x384xf32>
    %44 = vector.extract_strided_slice %27 {offsets = [1, 0], sizes = [1, 384], strides = [1, 1]} : vector<2x384xf32> to vector<1x384xf32>
    %cst_8 = arith.constant 5.000000e-01 : f32
    %45 = vector.broadcast %cst_8 : f32 to vector<1x384xf32>
    %46 = arith.mulf %44, %45 : vector<1x384xf32>
    %47 = arith.addf %43, %46 : vector<1x384xf32>
    %48 = vector.extract_strided_slice %5 {offsets = [0, 0], sizes = [1, 384], strides = [1, 1]} : vector<4x384xf32> to vector<1x384xf32>
    %49 = vector.extract_strided_slice %5 {offsets = [2, 0], sizes = [1, 384], strides = [1, 1]} : vector<4x384xf32> to vector<1x384xf32>
    %cst_9 = arith.constant 5.000000e-01 : f32
    %50 = vector.broadcast %cst_9 : f32 to vector<1x384xf32>
    %51 = arith.mulf %49, %50 : vector<1x384xf32>
    %52 = arith.subf %48, %51 : vector<1x384xf32>
    %53 = vector.extract_strided_slice %5 {offsets = [0, 0], sizes = [1, 384], strides = [1, 1]} : vector<4x384xf32> to vector<1x384xf32>
    %54 = vector.extract_strided_slice %5 {offsets = [2, 0], sizes = [1, 384], strides = [1, 1]} : vector<4x384xf32> to vector<1x384xf32>
    %cst_10 = arith.constant 5.000000e-01 : f32
    %55 = vector.broadcast %cst_10 : f32 to vector<1x384xf32>
    %56 = arith.mulf %54, %55 : vector<1x384xf32>
    %57 = arith.addf %53, %56 : vector<1x384xf32>
    %58 = vector.extract_strided_slice %5 {offsets = [1, 0], sizes = [1, 384], strides = [1, 1]} : vector<4x384xf32> to vector<1x384xf32>
    %59 = vector.extract_strided_slice %5 {offsets = [3, 0], sizes = [1, 384], strides = [1, 1]} : vector<4x384xf32> to vector<1x384xf32>
    %cst_11 = arith.constant 5.000000e-01 : f32
    %60 = vector.broadcast %cst_11 : f32 to vector<1x384xf32>
    %61 = arith.mulf %59, %60 : vector<1x384xf32>
    %62 = arith.subf %58, %61 : vector<1x384xf32>
    %63 = vector.extract_strided_slice %5 {offsets = [1, 0], sizes = [1, 384], strides = [1, 1]} : vector<4x384xf32> to vector<1x384xf32>
    %64 = vector.extract_strided_slice %5 {offsets = [3, 0], sizes = [1, 384], strides = [1, 1]} : vector<4x384xf32> to vector<1x384xf32>
    %cst_12 = arith.constant 5.000000e-01 : f32
    %65 = vector.broadcast %cst_12 : f32 to vector<1x384xf32>
    %66 = arith.mulf %64, %65 : vector<1x384xf32>
    %67 = arith.addf %63, %66 : vector<1x384xf32>
    %68 = arith.minimumf %37, %57 : vector<1x384xf32>
    %69 = arith.maximumf %32, %52 : vector<1x384xf32>
    %70 = arith.subf %68, %69 : vector<1x384xf32>
    %cst_13 = arith.constant 0.000000e+00 : f32
    %71 = vector.broadcast %cst_13 : f32 to vector<1x384xf32>
    %72 = arith.maximumf %70, %71 : vector<1x384xf32>
    %73 = arith.minimumf %47, %67 : vector<1x384xf32>
    %74 = arith.maximumf %42, %62 : vector<1x384xf32>
    %75 = arith.subf %73, %74 : vector<1x384xf32>
    %cst_14 = arith.constant 0.000000e+00 : f32
    %76 = vector.broadcast %cst_14 : f32 to vector<1x384xf32>
    %77 = arith.maximumf %75, %76 : vector<1x384xf32>
    %78 = arith.mulf %72, %77 : vector<1x384xf32>
    %79 = arith.subf %37, %32 : vector<1x384xf32>
    %80 = arith.subf %47, %42 : vector<1x384xf32>
    %cst_15 = arith.constant 1.000000e-07 : f32
    %81 = vector.broadcast %cst_15 : f32 to vector<1x384xf32>
    %82 = arith.addf %80, %81 : vector<1x384xf32>
    %83 = arith.subf %57, %52 : vector<1x384xf32>
    %84 = arith.subf %67, %62 : vector<1x384xf32>
    %cst_16 = arith.constant 1.000000e-07 : f32
    %85 = vector.broadcast %cst_16 : f32 to vector<1x384xf32>
    %86 = arith.addf %84, %85 : vector<1x384xf32>
    %87 = arith.mulf %79, %82 : vector<1x384xf32>
    %88 = arith.mulf %83, %86 : vector<1x384xf32>
    %89 = arith.addf %87, %88 : vector<1x384xf32>
    %90 = arith.subf %89, %78 : vector<1x384xf32>
    %cst_17 = arith.constant 1.000000e-07 : f32
    %91 = vector.broadcast %cst_17 : f32 to vector<1x384xf32>
    %92 = arith.addf %90, %91 : vector<1x384xf32>
    %93 = arith.divf %78, %92 : vector<1x384xf32>
    %94 = arith.maximumf %37, %57 : vector<1x384xf32>
    %95 = arith.minimumf %32, %52 : vector<1x384xf32>
    %96 = arith.subf %94, %95 : vector<1x384xf32>
    %97 = arith.maximumf %47, %67 : vector<1x384xf32>
    %98 = arith.minimumf %42, %62 : vector<1x384xf32>
    %99 = arith.subf %97, %98 : vector<1x384xf32>
    %100 = arith.mulf %96, %96 : vector<1x384xf32>
    %101 = arith.mulf %99, %99 : vector<1x384xf32>
    %102 = arith.addf %100, %101 : vector<1x384xf32>
    %cst_18 = arith.constant 1.000000e-07 : f32
    %103 = vector.broadcast %cst_18 : f32 to vector<1x384xf32>
    %104 = arith.addf %102, %103 : vector<1x384xf32>
    %105 = arith.addf %52, %57 : vector<1x384xf32>
    %106 = arith.subf %105, %32 : vector<1x384xf32>
    %107 = arith.subf %106, %37 : vector<1x384xf32>
    %108 = arith.mulf %107, %107 : vector<1x384xf32>
    %109 = arith.addf %62, %67 : vector<1x384xf32>
    %110 = arith.subf %109, %42 : vector<1x384xf32>
    %111 = arith.subf %110, %47 : vector<1x384xf32>
    %112 = arith.mulf %111, %111 : vector<1x384xf32>
    %113 = arith.addf %108, %112 : vector<1x384xf32>
    %cst_19 = arith.constant 2.500000e-01 : f32
    %114 = vector.broadcast %cst_19 : f32 to vector<1x384xf32>
    %115 = arith.mulf %113, %114 : vector<1x384xf32>
    %116 = arith.divf %83, %86 : vector<1x384xf32>
    %cst_20 = arith.constant 2.41421366 : f32
    %117 = vector.broadcast %cst_20 : f32 to vector<1x384xf32>
    %118 = arith.cmpf ogt, %116, %117 : vector<1x384xf32>
    %cst_21 = arith.constant 0.414213568 : f32
    %119 = vector.broadcast %cst_21 : f32 to vector<1x384xf32>
    %120 = arith.cmpf ogt, %116, %119 : vector<1x384xf32>
    %cst_22 = arith.constant dense<true> : vector<1x384xi1>
    %121 = arith.xori %118, %cst_22 : vector<1x384xi1>
    %122 = arith.andi %120, %121 : vector<1x384xi1>
    %cst_23 = arith.constant 0.785398185 : f32
    %cst_24 = arith.constant 0.000000e+00 : f32
    %123 = vector.broadcast %cst_23 : f32 to vector<1x384xf32>
    %124 = vector.broadcast %cst_24 : f32 to vector<1x384xf32>
    %125 = arith.select %122, %123, %124 : vector<1x384xi1>, vector<1x384xf32>
    %cst_25 = arith.constant 1.57079637 : f32
    %126 = vector.broadcast %cst_25 : f32 to vector<1x384xf32>
    %127 = arith.select %118, %126, %125 : vector<1x384xi1>, vector<1x384xf32>
    %cst_26 = arith.constant 9.99999996E-13 : f32
    %128 = vector.broadcast %cst_26 : f32 to vector<1x384xf32>
    %129 = arith.maximumf %116, %128 : vector<1x384xf32>
    %cst_27 = arith.constant -1.000000e+00 : f32
    %130 = vector.broadcast %cst_27 : f32 to vector<1x384xf32>
    %131 = arith.divf %130, %129 : vector<1x384xf32>
    %cst_28 = arith.constant 1.000000e+00 : f32
    %132 = vector.broadcast %cst_28 : f32 to vector<1x384xf32>
    %133 = arith.subf %116, %132 : vector<1x384xf32>
    %cst_29 = arith.constant 1.000000e+00 : f32
    %134 = vector.broadcast %cst_29 : f32 to vector<1x384xf32>
    %135 = arith.addf %116, %134 : vector<1x384xf32>
    %136 = arith.divf %133, %135 : vector<1x384xf32>
    %137 = arith.select %122, %136, %116 : vector<1x384xi1>, vector<1x384xf32>
    %138 = arith.select %118, %131, %137 : vector<1x384xi1>, vector<1x384xf32>
    %139 = arith.mulf %138, %138 : vector<1x384xf32>
    %cst_30 = arith.constant 0.0805374458 : f32
    %140 = vector.broadcast %cst_30 : f32 to vector<1x384xf32>
    %141 = arith.mulf %140, %139 : vector<1x384xf32>
    %cst_31 = arith.constant 0.138776854 : f32
    %142 = vector.broadcast %cst_31 : f32 to vector<1x384xf32>
    %143 = arith.subf %141, %142 : vector<1x384xf32>
    %144 = arith.mulf %143, %139 : vector<1x384xf32>
    %cst_32 = arith.constant 0.199777111 : f32
    %145 = vector.broadcast %cst_32 : f32 to vector<1x384xf32>
    %146 = arith.addf %144, %145 : vector<1x384xf32>
    %147 = arith.mulf %146, %139 : vector<1x384xf32>
    %cst_33 = arith.constant 0.333329499 : f32
    %148 = vector.broadcast %cst_33 : f32 to vector<1x384xf32>
    %149 = arith.subf %147, %148 : vector<1x384xf32>
    %150 = arith.mulf %149, %139 : vector<1x384xf32>
    %151 = arith.mulf %150, %138 : vector<1x384xf32>
    %152 = arith.addf %151, %138 : vector<1x384xf32>
    %153 = arith.addf %127, %152 : vector<1x384xf32>
    %154 = arith.divf %79, %82 : vector<1x384xf32>
    %cst_34 = arith.constant 2.41421366 : f32
    %155 = vector.broadcast %cst_34 : f32 to vector<1x384xf32>
    %156 = arith.cmpf ogt, %154, %155 : vector<1x384xf32>
    %cst_35 = arith.constant 0.414213568 : f32
    %157 = vector.broadcast %cst_35 : f32 to vector<1x384xf32>
    %158 = arith.cmpf ogt, %154, %157 : vector<1x384xf32>
    %cst_36 = arith.constant dense<true> : vector<1x384xi1>
    %159 = arith.xori %156, %cst_36 : vector<1x384xi1>
    %160 = arith.andi %158, %159 : vector<1x384xi1>
    %cst_37 = arith.constant 0.785398185 : f32
    %cst_38 = arith.constant 0.000000e+00 : f32
    %161 = vector.broadcast %cst_37 : f32 to vector<1x384xf32>
    %162 = vector.broadcast %cst_38 : f32 to vector<1x384xf32>
    %163 = arith.select %160, %161, %162 : vector<1x384xi1>, vector<1x384xf32>
    %cst_39 = arith.constant 1.57079637 : f32
    %164 = vector.broadcast %cst_39 : f32 to vector<1x384xf32>
    %165 = arith.select %156, %164, %163 : vector<1x384xi1>, vector<1x384xf32>
    %cst_40 = arith.constant 9.99999996E-13 : f32
    %166 = vector.broadcast %cst_40 : f32 to vector<1x384xf32>
    %167 = arith.maximumf %154, %166 : vector<1x384xf32>
    %cst_41 = arith.constant -1.000000e+00 : f32
    %168 = vector.broadcast %cst_41 : f32 to vector<1x384xf32>
    %169 = arith.divf %168, %167 : vector<1x384xf32>
    %cst_42 = arith.constant 1.000000e+00 : f32
    %170 = vector.broadcast %cst_42 : f32 to vector<1x384xf32>
    %171 = arith.subf %154, %170 : vector<1x384xf32>
    %cst_43 = arith.constant 1.000000e+00 : f32
    %172 = vector.broadcast %cst_43 : f32 to vector<1x384xf32>
    %173 = arith.addf %154, %172 : vector<1x384xf32>
    %174 = arith.divf %171, %173 : vector<1x384xf32>
    %175 = arith.select %160, %174, %154 : vector<1x384xi1>, vector<1x384xf32>
    %176 = arith.select %156, %169, %175 : vector<1x384xi1>, vector<1x384xf32>
    %177 = arith.mulf %176, %176 : vector<1x384xf32>
    %cst_44 = arith.constant 0.0805374458 : f32
    %178 = vector.broadcast %cst_44 : f32 to vector<1x384xf32>
    %179 = arith.mulf %178, %177 : vector<1x384xf32>
    %cst_45 = arith.constant 0.138776854 : f32
    %180 = vector.broadcast %cst_45 : f32 to vector<1x384xf32>
    %181 = arith.subf %179, %180 : vector<1x384xf32>
    %182 = arith.mulf %181, %177 : vector<1x384xf32>
    %cst_46 = arith.constant 0.199777111 : f32
    %183 = vector.broadcast %cst_46 : f32 to vector<1x384xf32>
    %184 = arith.addf %182, %183 : vector<1x384xf32>
    %185 = arith.mulf %184, %177 : vector<1x384xf32>
    %cst_47 = arith.constant 0.333329499 : f32
    %186 = vector.broadcast %cst_47 : f32 to vector<1x384xf32>
    %187 = arith.subf %185, %186 : vector<1x384xf32>
    %188 = arith.mulf %187, %177 : vector<1x384xf32>
    %189 = arith.mulf %188, %176 : vector<1x384xf32>
    %190 = arith.addf %189, %176 : vector<1x384xf32>
    %191 = arith.addf %165, %190 : vector<1x384xf32>
    %192 = arith.subf %153, %191 : vector<1x384xf32>
    %193 = arith.mulf %192, %192 : vector<1x384xf32>
    %cst_48 = arith.constant 0.405284733 : f32
    %194 = vector.broadcast %cst_48 : f32 to vector<1x384xf32>
    %195 = arith.mulf %194, %193 : vector<1x384xf32>
    %196 = arith.subf %195, %93 : vector<1x384xf32>
    %cst_49 = arith.constant 1.00000012 : f32
    %197 = vector.broadcast %cst_49 : f32 to vector<1x384xf32>
    %198 = arith.addf %196, %197 : vector<1x384xf32>
    %199 = arith.divf %195, %198 : vector<1x384xf32>
    %200 = arith.divf %115, %104 : vector<1x384xf32>
    %201 = arith.mulf %195, %199 : vector<1x384xf32>
    %202 = arith.addf %200, %201 : vector<1x384xf32>
    %203 = arith.subf %93, %202 : vector<1x384xf32>
    %cst_50 = arith.constant 0.000000e+00 : f32
    %204 = vector.broadcast %cst_50 : f32 to vector<1x384xf32>
    %205 = arith.maximumf %203, %204 : vector<1x384xf32>
    %cst_51 = arith.constant 1.000000e+00 : f32
    %206 = vector.broadcast %cst_51 : f32 to vector<1x384xf32>
    %207 = arith.mulf %206, %205 : vector<1x384xf32>
    %cst_52 = arith.constant 0.000000e+00 : f32
    %208 = vector.broadcast %cst_52 : f32 to vector<1x384xf32>
    %209 = arith.addf %208, %207 : vector<1x384xf32>
    %cst_53 = arith.constant 0.000000e+00 : f32
    %210 = vector.broadcast %cst_53 : f32 to vector<1x384xf32>
    %211 = arith.subf %210, %3 : vector<1x384xf32>
    %212 = arith.mulf %9, %211 : vector<1x384xf32>
    %213 = arith.mulf %212, %209 : vector<1x384xf32>
    %cst_54 = arith.constant 0.000000e+00 : f32
    %214 = vector.broadcast %cst_54 : f32 to vector<4x384xf32>
    %215 = arith.maximumf %4, %214 : vector<4x384xf32>
    %216 = arith.mulf %4, %7 : vector<4x384xf32>
    %217 = arith.subf %215, %216 : vector<4x384xf32>
    %218 = math.absf %4 : vector<4x384xf32>
    %cst_55 = arith.constant 0.000000e+00 : f32
    %219 = vector.broadcast %cst_55 : f32 to vector<4x384xf32>
    %220 = arith.subf %219, %218 : vector<4x384xf32>
    %221 = math.exp %220 : vector<4x384xf32>
    %cst_56 = arith.constant 1.000000e+00 : f32
    %222 = vector.broadcast %cst_56 : f32 to vector<4x384xf32>
    %223 = arith.addf %222, %221 : vector<4x384xf32>
    %224 = math.log %223 : vector<4x384xf32>
    %225 = arith.addf %217, %224 : vector<4x384xf32>
    %cst_57 = arith.constant dense<0.000000e+00> : vector<384xf32>
    %226 = vector.multi_reduction <add>, %225, %cst_57 [0] : vector<4x384xf32> to vector<384xf32>
    %227 = vector.shape_cast %226 : vector<384xf32> to vector<1x384xf32>
    %cst_58 = arith.constant 1.000000e+00 : f32
    %228 = vector.broadcast %cst_58 : f32 to vector<1x384xf32>
    %229 = arith.subf %228, %203 : vector<1x384xf32>
    %230 = arith.mulf %229, %8 : vector<1x384xf32>
    %231 = arith.mulf %227, %8 : vector<1x384xf32>
    %cst_59 = arith.constant 0.000000e+00 : f32
    %232 = vector.broadcast %cst_59 : f32 to vector<4x384xf32>
    %233 = tpu.concatenate %230, %231, %8, %213, %232 in 0 : vector<1x384xf32>, vector<1x384xf32>, vector<1x384xf32>, vector<1x384xf32>, vector<4x384xf32> -> vector<8x384xf32>
    %234 = tpu.iota {dimensions = array<i32: 0>} : vector<384x128xi32>
    %235 = tpu.iota {dimensions = array<i32: 1>} : vector<384x128xi32>
    %cst_60 = arith.constant 0.000000e+00 : f32
    %236 = vector.broadcast %cst_60 : f32 to vector<384x128xf32>
    %c0_i32 = arith.constant 0 : i32
    %237 = vector.broadcast %c0_i32 : i32 to vector<384x128xi32>
    %238 = arith.cmpi sge, %234, %237 : vector<384x128xi32>
    %c90_i32 = arith.constant 90 : i32
    %239 = vector.broadcast %c90_i32 : i32 to vector<384x128xi32>
    %240 = arith.cmpi slt, %234, %239 : vector<384x128xi32>
    %241 = arith.andi %238, %240 : vector<384x128xi1>
    %c0_i32_61 = arith.constant 0 : i32
    %242 = vector.broadcast %c0_i32_61 : i32 to vector<384x128xi32>
    %243 = arith.cmpi eq, %235, %242 : vector<384x128xi32>
    %244 = arith.andi %241, %243 : vector<384x128xi1>
    %cst_62 = arith.constant 1.000000e+00 : f32
    %245 = vector.broadcast %cst_62 : f32 to vector<384x128xf32>
    %246 = arith.select %244, %245, %236 : vector<384x128xi1>, vector<384x128xf32>
    %c90_i32_63 = arith.constant 90 : i32
    %247 = vector.broadcast %c90_i32_63 : i32 to vector<384x128xi32>
    %248 = arith.cmpi sge, %234, %247 : vector<384x128xi32>
    %c180_i32 = arith.constant 180 : i32
    %249 = vector.broadcast %c180_i32 : i32 to vector<384x128xi32>
    %250 = arith.cmpi slt, %234, %249 : vector<384x128xi32>
    %251 = arith.andi %248, %250 : vector<384x128xi1>
    %c1_i32 = arith.constant 1 : i32
    %252 = vector.broadcast %c1_i32 : i32 to vector<384x128xi32>
    %253 = arith.cmpi eq, %235, %252 : vector<384x128xi32>
    %254 = arith.andi %251, %253 : vector<384x128xi1>
    %cst_64 = arith.constant 1.000000e+00 : f32
    %255 = vector.broadcast %cst_64 : f32 to vector<384x128xf32>
    %256 = arith.select %254, %255, %246 : vector<384x128xi1>, vector<384x128xf32>
    %c180_i32_65 = arith.constant 180 : i32
    %257 = vector.broadcast %c180_i32_65 : i32 to vector<384x128xi32>
    %258 = arith.cmpi sge, %234, %257 : vector<384x128xi32>
    %c270_i32 = arith.constant 270 : i32
    %259 = vector.broadcast %c270_i32 : i32 to vector<384x128xi32>
    %260 = arith.cmpi slt, %234, %259 : vector<384x128xi32>
    %261 = arith.andi %258, %260 : vector<384x128xi1>
    %c2_i32 = arith.constant 2 : i32
    %262 = vector.broadcast %c2_i32 : i32 to vector<384x128xi32>
    %263 = arith.cmpi eq, %235, %262 : vector<384x128xi32>
    %264 = arith.andi %261, %263 : vector<384x128xi1>
    %cst_66 = arith.constant 1.000000e+00 : f32
    %265 = vector.broadcast %cst_66 : f32 to vector<384x128xf32>
    %266 = arith.select %264, %265, %256 : vector<384x128xi1>, vector<384x128xf32>
    %cst_67 = arith.constant dense<0.000000e+00> : vector<8x128xf32>
    %267 = tpu.matmul %233, %266, %cst_67 {dimension_numbers = #tpu.dot_dimension_numbers<[1], [0], [0], [1], [0, 0, 1, 1], [], []>} : vector<8x384xf32>, vector<384x128xf32>, vector<8x128xf32> -> vector<8x128xf32>
    %c0_68 = arith.constant 0 : index
    %c0_69 = arith.constant 0 : index
    %268 = vector.load %arg2[%c0_68, %c0_69] : memref<8x128xf32, #tpu.memory_space<vmem>>, vector<8x128xf32>
    tpu.vector_store %arg2[%c0_68, %c0_69], %267 {strides = array<i32>} : memref<8x128xf32, #tpu.memory_space<vmem>>, vector<8x128xf32>,
    return
  }
  func.func @transform_0(%arg0: i32) -> (i32, i32) {
    %c0_i32 = arith.constant 0 : i32
    %c0_i32_0 = arith.constant 0 : i32
    %c0_i32_1 = arith.constant 0 : i32
    return %c0_i32, %c0_i32_0 : i32, i32
  }
  func.func @transform_1(%arg0: i32) -> (i32, i32) {
    %c0_i32 = arith.constant 0 : i32
    %c0_i32_0 = arith.constant 0 : i32
    %c0_i32_1 = arith.constant 0 : i32
    return %c0_i32, %c0_i32_0 : i32, i32
  }
}

</mosaic_0001>

<bundles_post_ra>
// kernel: tpu_custom_call.1
= control target key start
LH: loop header
LB: loop body
LE: loop exit
PB: predicated region body
PF: predicated region fallthrough
CT: control target
= control target key end

     0   :  { %6 = vsyncpa [#allocation3], 0  ;;  %s3079_s0 = inlined_call_operand.hbm [shape: f32[40,384], index: 0, kind: input, shape index: {}]   ;;  %s3080_s1 = inlined_call_operand.hbm [shape: f32[8,128], index: 1, kind: output, shape index: {}]  }
   0x1   :  { %7 = vsyncpa [#allocation4], 0  ;;  %s12_s8 = sshll.u32 %s3079_s0, 4  ;;  %s2027_s9 = smov [#allocation2]   ;;  %s13_s8 = int_to_ptr.hbm [resolvable:$true] %s12_s8 }
   0x2   :  { %s14_s10 = sshll.u32 %s2027_s9, 4  ;;  %s2028_s11 = smov 384   ;;  %s15_s10 = int_to_ptr.vmem [resolvable:$true] %s14_s10 }
   0x3   :  { %s2029_s12 = smov 24  }
   0x4   :  { %20 = dma.hbm_to_vmem [thread:$0]  %s13_s8, 1920, %s15_s10, [#allocation3], %s2028_s11, %s2028_s11, %s2029_s12  }
   0x5   :  { %2023 = dma.done.wait [#allocation3], 1920  }
   0x6   :  { %2024 = vsyncadd [#allocation3], 4294965376  ;;  %v977_v0 = vlaneseq  ;;  %v2030_v4 = vmov 1.0   ;;  %v2066_v7 = vld [vmem:[#allocation2 + $0x10] sm:$0xff]  ;;  %v2031_v8 = vmov 0.0   ;;  %v2082_v12 = vld [vmem:[#allocation2 + $0x40] sm:$0xff] }
   0x7   :  { %v1831_v11 = vmul.f32 -1.442695, %v2066_v7  ;;  %v138_v14 = vmul.f32 0.5, %v2082_v12  ;;  %v25_v15 = vld [vmem:[#allocation2] sm:$0xff]  ;;  %v2172_v38 = vld [vmem:[#allocation2 + $0x30] sm:$0xff]  ;;  %v111_v52 = vrot.slane %v2082_v12, 2 }
   0x8   :  { %v2047_v1 = vand.u32 127, %v977_v0  ;;  %v978_v2 = vshrl.u32 %v977_v0, 7  ;;  %v1829_v17 = vmul.f32 -1.442695, %v25_v15  ;;  %v136_v42 = vmul.f32 0.5, %v2172_v38  ;;  %s2033_s0 = smov [#allocation5]  }
   0x9   :  { %1895 = vpow2.f32 %v1831_v11  ;;  %v144_v16 = vrot.slane %v138_v14, 2  ;;  %s1817_s13 = sshll.u32 %s2033_s0, 4  ;;  %s1819_s16 = sshll.u32 %s3080_s1, 4  ;;  %s1818_s13 = int_to_ptr.vmem [resolvable:$true] %s1817_s13  ;;  %s1820_s16 = int_to_ptr.hbm [resolvable:$true] %s1819_s16 }
   0xa   :  { %vm1413_vm0 = vcmp.eq.s32.totalorder %v2047_v1, 1  ;;  %vm1654_vm1 = vcmp.eq.s32.totalorder %v2047_v1, 2  ;;  %v989_v3 = vadd.s32 88, %v978_v2  ;;  %vm1172_vm2 = vcmp.eq.s32.totalorder %v2047_v1, 0 }
   0xb   :  { %1853 = vmatpush.msk.msra.mxu0 %vm1413_vm0, %v2030_v4  ;;  %1869 = vmatpush.msk.msra.mxu1 %vm1654_vm1, %v2030_v4  ;;  %v1011_v5 = vadd.s32 264, %v978_v2  ;;  %v1000_v6 = vadd.s32 176, %v978_v2  ;;  %v2105_v18 = vsub.f32 %v2082_v12, %v144_v16  ;;  %v2108_v19 = vadd.f32 %v144_v16, %v2082_v12 }
   0xc   :  { %vm1087_vm3 = vcmp.lt.s32.totalorder %v989_v3, 90  ;;  %vm1280_vm4 = vcmp.ge.s32.totalorder %v989_v3, 90  ;;  %1897 = vpow2.f32 %v1829_v17  ;;  %v142_v48 = vrot.slane %v136_v42, 2 }
   0xd   :  { %1854 = vmatpush.msk.msra.mxu0 %vm1413_vm0, %v2030_v4  ;;  %1870 = vmatpush.msk.msra.mxu1 %vm1654_vm1, %v2030_v4  ;;  %vm1184_vm5 = vmand %vm1087_vm3, %vm1172_vm2  ;;  %vm1591_vm7 = vcmp.lt.s32.totalorder %v1011_v5, 270  ;;  %vm1339_vm8 = vcmp.lt.s32.totalorder %v1000_v6, 180  ;;  %vm1532_vm11 = vcmp.ge.s32.totalorder %v1000_v6, 180  ;;  %v2118_v21 = vsub.f32 %v2108_v19, %v2105_v18 }
   0xe   :  { %v1232_v9 = vsel %vm1184_vm5, 1.0, %v2031_v8  ;;  %vm2071_vm6 = vmand %vm1280_vm4, %vm1413_vm0  ;;  %v2201_v59 = vsub.f32 %v2172_v38, %v142_v48  ;;  %v2204_v60 = vadd.f32 %v142_v48, %v2172_v38  ;;  %v297_v14 = vadd.f32 %v2108_v19, %v2105_v18 }
   0xf   :  { %1855 = vmatpush.msk.msra.mxu0 %vm1413_vm0, %v2030_v4  ;;  %1871 = vmatpush.msk.msra.mxu1 %vm1654_vm1, %v2030_v4  ;;  %v1473_v13 = vsel %vm2071_vm6, 1.0, %v1232_v9  ;;  %vm1688_vm9 = vmand %vm1591_vm7, %vm1654_vm1  ;;  %v1896_v20 = vpop.eup %1895  ;;  %v189_v24 = vadd.f32 1e-07, %v2118_v21 }
  0x10   :  { %1885 = vmatpush.msk.msra.mxu2 %vm1688_vm9, %v2030_v4  ;;  %vm1436_vm10 = vmand %vm1339_vm8, %vm1413_vm0  ;;  %v51_v23 = vadd.f32 1.0, %v1896_v20  ;;  %v2220_v6 = vsub.f32 %v2204_v60, %v2201_v59 }
  0x11   :  { %1856 = vmatpush.msk.msra.mxu0 %vm1413_vm0, %v2030_v4  ;;  %1872 = vmatpush.msk.msra.mxu1 %vm1654_vm1, %v2030_v4  ;;  %v1484_v22 = vsel %vm1436_vm10, 1.0, %v2031_v8  ;;  %vm1677_vm12 = vmand %vm1532_vm11, %vm1654_vm1  ;;  %v2136_v27 = vrot.slane %v189_v24, 1 }
  0x12   :  { %1886 = vmatpush.msk.msra.mxu2 %vm1654_vm1, %v2030_v4  ;;  %1899 = vrcp.f32 %v51_v23  ;;  %v1898_v25 = vpop.eup %1897  ;;  %v1725_v26 = vsel %vm1677_vm12, 1.0, %v1484_v22  ;;  %v93_v31 = vand.u32 2147483648, %v51_v23  ;;  %vm87_vm13 = vweird.f32 %v51_v23 }
  0x13   :  { %1755 = vmatpush.msra.mxu0 %v1473_v13  ;;  %1873 = vmatpush.msk.msra.mxu1 %vm1654_vm1, %v2030_v4  ;;  %v2144_v28 = vadd.f32 1.0, %v1898_v25  ;;  %1901 = vrcp.f32 %v2136_v27  ;;  %v91_v34 = vand.u32 2147483647, %v51_v23  ;;  %v363_v46 = vand.u32 2147483648, %v2136_v27 }
  0x14   :  { %v94_v40 = vor.u32 1.1754944e-38, %v93_v31  ;;  %vm357_vm3 = vweird.f32 %v2136_v27  ;;  %v361_v53 = vand.u32 2147483647, %v2136_v27  ;;  %v187_v16 = vadd.f32 1e-07, %v2220_v6 }
  0x15   :  { %1857 = vmatpush.msk.msra.mxu0 %vm1172_vm2, %v2030_v4  ;;  %1874 = vmatpush.msk.msra.mxu1 %vm1654_vm1, %v2030_v4  ;;  %1903 = vrcp.f32 %v2144_v28  ;;  %v364_v54 = vor.u32 1.1754944e-38, %v363_v46  ;;  %v63_v63 = vand.u32 2147483648, %v2144_v28  ;;  %v61_v5 = vand.u32 2147483647, %v2144_v28 }
  0x16   :  { %vm362_vm6 = vcmp.eq.f32.partialorder %v361_v53, 8.507059e+37 }
  0x17   :  { %1858 = vmatpush.msk.msra.mxu0 %vm1172_vm2, %v2030_v4  ;;  %1875 = vmatpush.msk.msra.mxu1 %vm1654_vm1, %v2030_v4  ;;  %v64_v13 = vor.u32 1.1754944e-38, %v63_v63  ;;  %vm62_vm8 = vcmp.eq.f32.partialorder %v61_v5, 8.507059e+37 }
  0x18   :  { %v1900_v29 = vpop.eup %1899 }
  0x19   :  { %1859 = vmatpush.msk.msra.mxu0 %vm1172_vm2, %v2030_v4  ;;  %1876 = vmatpush.msk.msra.mxu1 %vm1654_vm1, %v2030_v4  ;;  %v83_v30 = vmul.f32 %v1900_v29, %v51_v23  ;;  %v1902_v32 = vpop.eup %1901  ;;  %vm88_vm14 = vweird.f32 %v1900_v29 }
  0x1a   :  { %v353_v36 = vmul.f32 %v1902_v32, %v2136_v27  ;;  %vm89_vm15 = vmor %vm87_vm13, %vm88_vm14  ;;  %vm358_vm4 = vweird.f32 %v1902_v32 }
  0x1b   :  { %1860 = vmatpush.msk.msra.mxu0 %vm1172_vm2, %v2030_v4  ;;  %1877 = vmatpush.msk.msra.mxu1 %vm1654_vm1, %v2030_v4  ;;  %v84_v33 = vsub.f32 1.0, %v83_v30  ;;  %v2163_v35 = vpop.eup %1903  ;;  %vm92_vm1 = vcmp.eq.f32.partialorder %v91_v34, 8.507059e+37  ;;  %vm359_vm5 = vmor %vm357_vm3, %vm358_vm4  ;;  %vm2032_vm4 = vmmov 1  }
  0x1c   :  { %v53_v39 = vmul.f32 %v2163_v35, %v2144_v28  ;;  %v354_v41 = vsub.f32 1.0, %v353_v36 }
  0x1d   :  { %1861 = vmatpush.msk.msra.mxu0 %vm1172_vm2, %v2030_v4  ;;  %1780 = vmatpush.msra.mxu1 %v1725_v26  ;;  %v85_v37 = vmul.f32 %v1900_v29, %v84_v33 }
  0x1e   :  { %v355_v44 = vmul.f32 %v1902_v32, %v354_v41  ;;  %v54_v47 = vsub.f32 1.0, %v53_v39 }
  0x1f   :  { %1862 = vmatpush.msk.msra.mxu0 %vm1172_vm2, %v2030_v4  ;;  %1878 = vmatpush.msk.msra.mxu1 %vm1413_vm0, %v2030_v4  ;;  %v86_v43 = vadd.f32 %v1900_v29, %v85_v37 }
  0x20   :  { %v356_v50 = vadd.f32 %v1902_v32, %v355_v44  ;;  %v55_v58 = vmul.f32 %v2163_v35, %v54_v47 }
  0x21   :  { %1863 = vmatpush.msk.msra.mxu0 %vm1172_vm2, %v2030_v4  ;;  %1879 = vmatpush.msk.msra.mxu1 %vm1413_vm0, %v2030_v4  ;;  %v90_v45 = vsel %vm89_vm15, %v1900_v29, %v86_v43 }
  0x22   :  { %v95_v49 = vsel %vm92_vm1, %v94_v40, %v90_v45  ;;  %v360_v55 = vsel %vm359_vm5, %v1902_v32, %v356_v50 }
  0x23   :  { %1864 = vmatpush.msk.msra.mxu0 %vm1172_vm2, %v2030_v4  ;;  %1880 = vmatpush.msk.msra.mxu1 %vm1413_vm0, %v2030_v4  ;;  %v99_v51 = vmul.f32 2.0, %v95_v49  ;;  %v365_v57 = vsel %vm362_vm6, %v364_v54, %v360_v55 }
  0x24   :  { %v2207_v62 = vmul.f32 %v365_v57, %v2118_v21 }
  0x25   :  { %1865 = vmatpush.msk.msra.mxu0 %vm1172_vm2, %v2030_v4  ;;  %1881 = vmatpush.msk.msra.mxu1 %vm1413_vm0, %v2030_v4  ;;  %v105_v56 = vmul.f32 %v99_v51, %v99_v51  ;;  %v1834_v0 = vadd.f32 -0.5, %v99_v51 }
  0x26   :  { %v387_v2 = vmax.f32 %v2207_v62, 1e-12  ;;  %v2214_v3 = vadd.f32 1.0, %v2207_v62  ;;  %vm369_vm11 = vcmp.gt.f32.partialorder %v2207_v62, 2.4142137 }
  0x27   :  { %1866 = vmatpush.msk.msra.mxu0 %vm1172_vm2, %v2030_v4  ;;  %1882 = vmatpush.msk.msra.mxu1 %vm1413_vm0, %v2030_v4  ;;  %v117_v61 = vmul.f32 %v111_v52, %v105_v56  ;;  %v109_v56 = vrot.slane %v2172_v38, 2  ;;  %vm372_vm3 = vcmp.gt.f32.partialorder %v2207_v62, 0.41421357  ;;  %vm375_vm5 = vmxor %vm369_vm11, %vm2032_vm4  ;;  %v1837_v38 = vadd.f32 -1.0, %v2207_v62 }
  0x28   :  { %1905 = vrcp.f32 %v387_v2  ;;  %vm423_vm9 = vweird.f32 %v387_v2  ;;  %v427_v43 = vand.u32 2147483647, %v387_v2  ;;  %vm474_vm13 = vweird.f32 %v2214_v3 }
  0x29   :  { %1867 = vmatpush.msk.msra.mxu0 %vm1172_vm2, %v2030_v4  ;;  %1883 = vmatpush.msk.msra.mxu1 %vm1413_vm0, %v2030_v4  ;;  %vm57_vm0 = vweird.f32 %v2144_v28  ;;  %vm58_vm2 = vweird.f32 %v2163_v35  ;;  %v120_v1 = vmul.f32 0.5, %v117_v61  ;;  %v56_v4 = vadd.f32 %v2163_v35, %v55_v58 }
  0x2a   :  { %vm2222_vm7 = vmor %vm57_vm0, %vm58_vm2  ;;  %1907 = vrcp.f32 %v2214_v3  ;;  %v478_v50 = vand.u32 2147483647, %v2214_v3  ;;  %vm2265_vm15 = vcmp.eq.f32.partialorder %v427_v43, 8.507059e+37  ;;  %v480_v53 = vand.u32 2147483648, %v2214_v3 }
  0x2b   :  { %v126_v9 = vrot.slane %v120_v1, 2  ;;  %v60_v15 = vsel %vm2222_vm7, %v2163_v35, %v56_v4  ;;  %v2244_v35 = vrot.slane %v187_v16, 1  ;;  %vm2292_vm0 = vmand %vm372_vm3, %vm375_vm5 }
  0x2c   :  { %v65_v30 = vsel %vm62_vm8, %v64_v13, %v60_v15  ;;  %v481_v63 = vor.u32 1.1754944e-38, %v480_v53  ;;  %vm479_vm6 = vcmp.eq.f32.partialorder %v478_v50, 8.507059e+37 }
  0x2d   :  { %v132_v11 = vsub.f32 %v1834_v0, %v126_v9  ;;  %v135_v12 = vadd.f32 %v1834_v0, %v126_v9  ;;  %v2250_v40 = vmul.f32 2.0, %v65_v30  ;;  %1909 = vrcp.f32 %v2244_v35 }
  0x2e   :  { %v1906_v26 = vpop.eup %1905  ;;  %vm327_vm7 = vweird.f32 %v2244_v35 }
  0x2f   :  { %v156_v17 = vmin.f32 %v135_v12, %v2108_v19  ;;  %v159_v20 = vmax.f32 %v132_v11, %v2105_v18  ;;  %v2235_v22 = vsub.f32 %v135_v12, %v132_v11  ;;  %v270_v23 = vmax.f32 %v135_v12, %v2108_v19 }
  0x30   :  { %v273_v24 = vmin.f32 %v132_v11, %v2105_v18  ;;  %v300_v25 = vsub.f32 %v297_v14, %v132_v11  ;;  %v1908_v31 = vpop.eup %1907  ;;  %v419_v34 = vmul.f32 %v1906_v26, %v387_v2  ;;  %v213_v18 = vmul.f32 %v2136_v27, %v2118_v21 }
  0x31   :  { %v162_v28 = vsub.f32 %v156_v17, %v159_v20  ;;  %v183_v29 = vadd.f32 1e-07, %v2235_v22  ;;  %v429_v19 = vand.u32 2147483648, %v387_v2  ;;  %vm424_vm10 = vweird.f32 %v1906_v26 }
  0x32   :  { %v2240_v32 = vsub.f32 %v270_v23, %v273_v24  ;;  %v2242_v33 = vsub.f32 %v300_v25, %v135_v12  ;;  %v420_v39 = vsub.f32 1.0, %v419_v34  ;;  %v470_v44 = vmul.f32 %v1908_v31, %v2214_v3  ;;  %vm2259_vm12 = vmor %vm423_vm9, %vm424_vm10 }
  0x33   :  { %v165_v36 = vmax.f32 %v162_v28, 0.0  ;;  %v2246_v37 = vrot.slane %v183_v29, 1  ;;  %v430_v47 = vor.u32 1.1754944e-38, %v429_v19  ;;  %vm475_vm14 = vweird.f32 %v1908_v31  ;;  %v1910_v0 = vpop.eup %1909 }
  0x34   :  { %v421_v45 = vmul.f32 %v1906_v26, %v420_v39  ;;  %v471_v48 = vsub.f32 1.0, %v470_v44  ;;  %v103_v55 = vmul.f32 %v2250_v40, %v2250_v40  ;;  %vm2277_vm1 = vmor %vm474_vm13, %vm475_vm14  ;;  %v323_v12 = vmul.f32 %v1910_v0, %v2244_v35 }
  0x35   :  { %v171_v41 = vrot.slane %v165_v36, 1  ;;  %v201_v42 = vmul.f32 %v2246_v37, %v2235_v22  ;;  %1911 = vrcp.f32 %v2246_v37  ;;  %vm558_vm2 = vweird.f32 %v2246_v37 }
  0x36   :  { %v422_v49 = vadd.f32 %v1906_v26, %v421_v45  ;;  %v472_v52 = vmul.f32 %v1908_v31, %v471_v48  ;;  %v115_v3 = vmul.f32 %v109_v56, %v103_v55  ;;  %v564_v15 = vand.u32 2147483648, %v2246_v37 }
  0x37   :  { %v2257_v46 = vmul.f32 %v171_v41, %v165_v36  ;;  %v216_v21 = vadd.f32 %v213_v18, %v201_v42  ;;  %v324_v16 = vsub.f32 1.0, %v323_v12  ;;  %vm328_vm8 = vweird.f32 %v1910_v0 }
  0x38   :  { %v426_v54 = vsel %vm2259_vm12, %v1906_v26, %v422_v49  ;;  %v473_v58 = vadd.f32 %v1908_v31, %v472_v52  ;;  %v331_v17 = vand.u32 2147483647, %v2244_v35  ;;  %v562_v24 = vand.u32 2147483647, %v2246_v37  ;;  %vm329_vm10 = vmor %vm327_vm7, %vm328_vm8  ;;  %v26_v52 = vld [vmem:[#allocation2 + $0x8] sm:$0xff] }
  0x39   :  { %v219_v57 = vsub.f32 %v216_v21, %v2257_v46  ;;  %v431_v1 = vsel %vm2265_vm15, %v430_v47, %v426_v54  ;;  %v325_v26 = vmul.f32 %v1910_v0, %v324_v16  ;;  %v333_v28 = vand.u32 2147483648, %v2244_v35 }
  0x3a   :  { %v477_v2 = vsel %vm2277_vm1, %v1908_v31, %v473_v58  ;;  %v432_v10 = vmul.f32 -1.0, %v431_v1  ;;  %v565_v30 = vor.u32 1.1754944e-38, %v564_v15  ;;  %vm332_vm13 = vcmp.eq.f32.partialorder %v331_v17, 8.507059e+37 }
  0x3b   :  { %v1912_v4 = vpop.eup %1911  ;;  %v2290_v5 = vadd.f32 1e-07, %v219_v57  ;;  %v482_v11 = vsel %vm479_vm6, %v481_v63, %v477_v2  ;;  %v326_v31 = vadd.f32 %v1910_v0, %v325_v26  ;;  %v334_v34 = vor.u32 1.1754944e-38, %v333_v28 }
  0x3c   :  { %v483_v13 = vmul.f32 %v1837_v38, %v482_v11  ;;  %v554_v14 = vmul.f32 %v1912_v4, %v2246_v37  ;;  %vm559_vm9 = vweird.f32 %v1912_v4  ;;  %vm563_vm14 = vcmp.eq.f32.partialorder %v562_v24, 8.507059e+37 }
  0x3d   :  { %1913 = vrcp.f32 %v2290_v5  ;;  %vm560_vm12 = vmor %vm558_vm2, %vm559_vm9  ;;  %v118_v19 = vmul.f32 0.5, %v115_v3  ;;  %v330_v39 = vsel %vm329_vm10, %v1910_v0, %v326_v31  ;;  %v1832_v21 = vadd.f32 -0.5, %v2250_v40 }
  0x3e   :  { %v486_v20 = vsel %vm2292_vm0, %v483_v13, %v2207_v62  ;;  %v555_v23 = vsub.f32 1.0, %v554_v14  ;;  %v335_v42 = vsel %vm332_vm13, %v334_v34, %v330_v39  ;;  %v279_v48 = vmul.f32 %v2240_v32, %v2240_v32 }
  0x3f   :  { %v2308_v25 = vsel %vm369_vm11, %v432_v10, %v486_v20  ;;  %v124_v27 = vrot.slane %v118_v19, 2  ;;  %v2326_v47 = vmul.f32 %v335_v42, %v2220_v6  ;;  %v306_v49 = vmul.f32 %v2242_v33, %v2242_v33  ;;  %v2364_v10 = vld [vmem:[#allocation2 + $0x28] sm:$0xff] }
  0x40   :  { %v556_v29 = vmul.f32 %v1912_v4, %v555_v23  ;;  %v2316_v36 = vmul.f32 %v2308_v25, %v2308_v25  ;;  %v1830_v33 = vmul.f32 -1.442695, %v26_v52  ;;  %v285_v55 = vrot.slane %v279_v48, 1 }
  0x41   :  { %v2338_v53 = vsub.f32 %v1832_v21, %v124_v27  ;;  %v2340_v54 = vadd.f32 %v1832_v21, %v124_v27  ;;  %v2343_v32 = vmax.f32 %v2326_v47, 1e-12  ;;  %v312_v56 = vrot.slane %v306_v49, 1 }
  0x42   :  { %v557_v18 = vadd.f32 %v1912_v4, %v556_v29  ;;  %v495_v37 = vmul.f32 0.080537446, %v2316_v36  ;;  %v2347_v57 = vadd.f32 1.0, %v2326_v47  ;;  %v2358_v0 = vsel %vm2292_vm0, 0.7853982, %v2031_v8 }
  0x43   :  { %v2318_v44 = vpop.eup %1913  ;;  %v2352_v63 = vsub.f32 %v2340_v54, %v2338_v53  ;;  %v264_v38 = vand.u32 2147483648, %v2290_v5  ;;  %v291_v2 = vadd.f32 %v285_v55, %v279_v48  ;;  %v2361_v3 = vadd.f32 %v312_v56, %v306_v49 }
  0x44   :  { %v561_v41 = vsel %vm560_vm12, %v1912_v4, %v557_v18  ;;  %v1840_v40 = vadd.f32 -0.13877685, %v495_v37  ;;  %vm258_vm15 = vweird.f32 %v2290_v5  ;;  %vm259_vm1 = vweird.f32 %v2318_v44 }
  0x45   :  { %v566_v43 = vsel %vm563_vm14, %v565_v30, %v561_v41  ;;  %v181_v9 = vadd.f32 1e-07, %v2352_v63  ;;  %v882_v28 = vand.u32 2147483647, %v2364_v10  ;;  %v154_v56 = vmin.f32 %v2340_v54, %v2204_v60 }
  0x46   :  { %v2322_v45 = vmul.f32 %v566_v43, %v2235_v22  ;;  %v254_v22 = vmul.f32 %v2318_v44, %v2290_v5  ;;  %v501_v61 = vmul.f32 %v1840_v40, %v2316_v36 }
  0x47   :  { %v2379_v34 = vrot.slane %v181_v9, 1  ;;  %v885_v42 = vsub.f32 0.0, %v882_v28 }
  0x48   :  { %v588_v50 = vmax.f32 %v2322_v45, 1e-12  ;;  %v2334_v51 = vadd.f32 1.0, %v2322_v45  ;;  %v255_v58 = vsub.f32 1.0, %v254_v22  ;;  %v504_v12 = vadd.f32 0.19977711, %v501_v61 }
  0x49   :  { %vm570_vm2 = vcmp.gt.f32.partialorder %v2322_v45, 2.4142137  ;;  %vm573_vm7 = vcmp.gt.f32.partialorder %v2322_v45, 0.41421357  ;;  %v1846_v48 = vadd.f32 -1.0, %v2322_v45 }
  0x4a   :  { %1915 = vrcp.f32 %v588_v50  ;;  %v256_v11 = vmul.f32 %v2318_v44, %v255_v58  ;;  %vm624_vm3 = vweird.f32 %v588_v50  ;;  %v628_v14 = vand.u32 2147483647, %v588_v50  ;;  %vm576_vm12 = vmxor %vm570_vm2, %vm2032_vm4 }
  0x4b   :  { %1917 = vrcp.f32 %v2334_v51  ;;  %v630_v15 = vand.u32 2147483648, %v588_v50  ;;  %vm675_vm6 = vweird.f32 %v2334_v51  ;;  %v681_v20 = vand.u32 2147483648, %v2334_v51  ;;  %vm2417_vm14 = vmand %vm573_vm7, %vm576_vm12 }
  0x4c   :  { %1919 = vrcp.f32 %v2343_v32  ;;  %v679_v26 = vand.u32 2147483647, %v2334_v51  ;;  %v507_v30 = vmul.f32 %v504_v12, %v2316_v36  ;;  %vm629_vm9 = vcmp.eq.f32.partialorder %v628_v14, 8.507059e+37 }
  0x4d   :  { %1921 = vpow2.f32 %v1830_v33  ;;  %v631_v39 = vor.u32 1.1754944e-38, %v630_v15  ;;  %v682_v21 = vor.u32 1.1754944e-38, %v681_v20  ;;  %v157_v58 = vmax.f32 %v2338_v53, %v2201_v59 }
  0x4e   :  { %1923 = vrcp.f32 %v2347_v57  ;;  %vm680_vm13 = vcmp.eq.f32.partialorder %v679_v26, 8.507059e+37  ;;  %v1843_v52 = vadd.f32 -0.3333295, %v507_v30  ;;  %v2422_v9 = vadd.f32 %v2318_v44, %v256_v11 }
  0x4f   :  { %v2433_v15 = vadd.f32 1e-07, %v291_v2  ;;  %v262_v20 = vand.u32 2147483647, %v2290_v5  ;;  %v2447_v26 = vmul.f32 0.25, %v2361_v3 }
  0x50   :  { %v1916_v1 = vpop.eup %1915  ;;  %v513_v11 = vmul.f32 %v1843_v52, %v2316_v36  ;;  %v397_v30 = vand.u32 2147483647, %v2343_v32  ;;  %v36_v52 = vld [vmem:[#allocation2 + $0x58] sm:$0xff]  ;;  %vm370_vm12 = vcmp.gt.f32.partialorder %v2326_v47, 0.41421357 }
  0x51   :  { %v1918_v4 = vpop.eup %1917  ;;  %v620_v13 = vmul.f32 %v1916_v1, %v588_v50  ;;  %vm625_vm5 = vweird.f32 %v1916_v1  ;;  %v890_v50 = vmul.f32 1.442695, %v885_v42  ;;  %v399_v42 = vand.u32 2147483648, %v2343_v32 }
  0x52   :  { %v671_v16 = vmul.f32 %v1918_v4, %v2334_v51  ;;  %v2373_v23 = vpop.eup %1919  ;;  %vm676_vm0 = vweird.f32 %v1918_v4  ;;  %vm2386_vm8 = vmor %vm624_vm3, %vm625_vm5  ;;  %vm2522_vm7 = vcmp.eq.f32.partialorder %v397_v30, 8.507059e+37 }
  0x53   :  { %v621_v17 = vsub.f32 1.0, %v620_v13  ;;  %v1922_v29 = vpop.eup %1921  ;;  %vm2393_vm10 = vmor %vm675_vm6, %vm676_vm0  ;;  %v389_v27 = vmul.f32 %v2373_v23, %v2343_v32  ;;  %1925 = vpow2.f32 %v890_v50  ;;  %vm367_vm0 = vcmp.gt.f32.partialorder %v2326_v47, 2.4142137 }
  0x54   :  { %v672_v24 = vsub.f32 1.0, %v671_v16  ;;  %v2381_v18 = vpop.eup %1923  ;;  %v2407_v40 = vadd.f32 1.0, %v1922_v29  ;;  %1927 = vrcp.f32 %v2379_v34  ;;  %vm2429_vm3 = vmor %vm258_vm15, %vm259_vm1  ;;  %v2438_v16 = vsel %vm369_vm11, 1.5707964, %v2358_v0 }
  0x55   :  { %v622_v31 = vmul.f32 %v1916_v1, %v621_v17  ;;  %v440_v22 = vmul.f32 %v2381_v18, %v2347_v57  ;;  %v390_v13 = vsub.f32 1.0, %v389_v27  ;;  %v2456_v0 = vsub.f32 %v154_v56, %v157_v58 }
  0x56   :  { %v673_v41 = vmul.f32 %v1918_v4, %v672_v24  ;;  %v2444_v24 = vor.u32 1.1754944e-38, %v264_v38  ;;  %1929 = vrcp.f32 %v2407_v40  ;;  %v261_v5 = vsel %vm2429_vm3, %v2318_v44, %v2422_v9 }
  0x57   :  { %v623_v43 = vadd.f32 %v1916_v1, %v622_v31  ;;  %v441_v17 = vsub.f32 1.0, %v440_v22  ;;  %v391_v36 = vmul.f32 %v2373_v23, %v390_v13  ;;  %v582_v38 = vsel %vm2417_vm14, 0.7853982, %v2031_v8 }
  0x58   :  { %v674_v49 = vadd.f32 %v1918_v4, %v673_v41  ;;  %vm393_vm11 = vweird.f32 %v2343_v32  ;;  %v516_v29 = vmul.f32 %v513_v11, %v2308_v25  ;;  %vm394_vm15 = vweird.f32 %v2373_v23 }
  0x59   :  { %v627_v51 = vsel %vm2386_vm8, %v1916_v1, %v623_v43  ;;  %v1926_v28 = vpop.eup %1925  ;;  %v442_v31 = vmul.f32 %v2381_v18, %v441_v17  ;;  %1931 = vrcp.f32 %v2433_v15  ;;  %v163_v43 = vmax.f32 %v2456_v0, 0.0  ;;  %vm2493_vm6 = vmor %vm393_vm11, %vm394_vm15 }
  0x5a   :  { %v632_v33 = vsel %vm629_vm9, %v631_v39, %v627_v51  ;;  %v678_v55 = vsel %vm2393_vm10, %v1918_v4, %v674_v49  ;;  %v2476_v19 = vpop.eup %1927  ;;  %v894_v41 = vadd.f32 1.0, %v1926_v28  ;;  %v392_v37 = vadd.f32 %v2373_v23, %v391_v36  ;;  %vm373_vm15 = vmxor %vm367_vm0, %vm2032_vm4 }
  0x5b   :  { %v633_v1 = vmul.f32 -1.0, %v632_v33  ;;  %v683_v12 = vsel %vm680_vm13, %v682_v21, %v678_v55  ;;  %vm444_vm1 = vweird.f32 %v2347_v57  ;;  %vm445_vm5 = vweird.f32 %v2381_v18 }
  0x5c   :  { %v684_v4 = vmul.f32 %v1846_v48, %v683_v12  ;;  %v2487_v21 = vsel %vm570_vm2, 1.5707964, %v582_v38  ;;  %1933 = vlog2.f32 %v894_v41  ;;  %v450_v49 = vand.u32 2147483648, %v2347_v57  ;;  %v2498_v50 = vpop.eup %1929 }
  0x5d   :  { %v448_v51 = vand.u32 2147483647, %v2347_v57  ;;  %v524_v22 = vmul.f32 %v2476_v19, %v2379_v34  ;;  %v519_v32 = vadd.f32 %v516_v29, %v2308_v25  ;;  %v199_v55 = vmul.f32 %v2379_v34, %v2352_v63 }
  0x5e   :  { %v687_v2 = vsel %vm2417_vm14, %v684_v4, %v2322_v45  ;;  %v443_v45 = vadd.f32 %v2381_v18, %v442_v31  ;;  %v211_v56 = vmul.f32 %v2244_v35, %v2220_v6  ;;  %v169_v61 = vrot.slane %v163_v43, 1 }
  0x5f   :  { %v2454_v62 = vsel %vm570_vm2, %v633_v1, %v687_v2  ;;  %vm2515_vm2 = vmor %vm444_vm1, %vm445_vm5  ;;  %v396_v25 = vsel %vm2493_vm6, %v2373_v23, %v392_v37  ;;  %v400_v12 = vor.u32 1.1754944e-38, %v399_v42  ;;  %v1932_v13 = vpop.eup %1931  ;;  %v873_v35 = vmax.f32 %v2364_v10, 0.0 }
  0x60   :  { %v2469_v3 = vmul.f32 %v2454_v62, %v2454_v62  ;;  %v876_v57 = vmul.f32 %v36_v52, %v2364_v10  ;;  %v451_v4 = vor.u32 1.1754944e-38, %v450_v49  ;;  %vm528_vm8 = vweird.f32 %v2379_v34 }
  0x61   :  { %v815_v11 = vmul.f32 %v1932_v13, %v2433_v15  ;;  %v447_v23 = vsel %vm2515_vm2, %v2381_v18, %v443_v45  ;;  %vm449_vm9 = vcmp.eq.f32.partialorder %v448_v51, 8.507059e+37  ;;  %v525_v17 = vsub.f32 1.0, %v524_v22  ;;  %vm2564_vm2 = vmand %vm370_vm12, %vm373_vm15 }
  0x62   :  { %v696_v39 = vmul.f32 0.080537446, %v2469_v3  ;;  %v1934_v2 = vpop.eup %1933  ;;  %vm2533_vm10 = vcmp.eq.f32.partialorder %v262_v20, 8.507059e+37  ;;  %v879_v38 = vsub.f32 %v873_v35, %v876_v57  ;;  %v1835_v10 = vadd.f32 -1.0, %v2326_v47  ;;  %v2580_v35 = vld [vmem:[#allocation2 + $0x18] sm:$0xff] }
  0x63   :  { %v522_v28 = vadd.f32 %v519_v32, %v2438_v16  ;;  %v816_v29 = vsub.f32 1.0, %v815_v11  ;;  %v900_v30 = vmul.f32 0.6931472, %v1934_v2  ;;  %v214_v31 = vadd.f32 %v211_v56, %v199_v55 }
  0x64   :  { %v1849_v27 = vadd.f32 -0.13877685, %v696_v39  ;;  %v2541_v39 = vmul.f32 %v169_v61, %v163_v43  ;;  %v401_v20 = vsel %vm2522_vm7, %v400_v12, %v396_v25  ;;  %v452_v41 = vsel %vm449_vm9, %v451_v4, %v447_v23 }
  0x65   :  { %v817_v42 = vmul.f32 %v1932_v13, %v816_v29  ;;  %v903_v37 = vadd.f32 %v900_v30, %v879_v38  ;;  %v526_v48 = vmul.f32 %v2476_v19, %v525_v17  ;;  %v825_v16 = vand.u32 2147483648, %v2433_v15 }
  0x66   :  { %v702_v33 = vmul.f32 %v1849_v27, %v2469_v3  ;;  %v268_v27 = vmax.f32 %v2340_v54, %v2204_v60  ;;  %vm904_vm13 = vcmask 1043456   ;;  %v271_v43 = vmin.f32 %v2338_v53, %v2201_v59 }
  0x67   :  { %v818_v52 = vadd.f32 %v1932_v13, %v817_v42  ;;  %vm819_vm14 = vweird.f32 %v2433_v15  ;;  %vm820_vm11 = vweird.f32 %v1932_v13  ;;  %v823_v45 = vand.u32 2147483647, %v2433_v15 }
  0x68   :  { %v705_v6 = vadd.f32 0.19977711, %v702_v33  ;;  %vm821_vm1 = vmor %vm819_vm14, %vm820_vm11  ;;  %vm529_vm5 = vweird.f32 %v2476_v19  ;;  %v532_v22 = vand.u32 2147483647, %v2379_v34  ;;  %v919_v33 = vsel %vm904_vm13, %v903_v37, 0.0 }
  0x69   :  { %v822_v32 = vsel %vm821_vm1, %v1932_v13, %v818_v52  ;;  %vm824_vm6 = vcmp.eq.f32.partialorder %v823_v45, 8.507059e+37  ;;  %v453_v55 = vmul.f32 %v1835_v10, %v452_v41  ;;  %v920_v58 = vrot.slane %v919_v33, 4  ;;  %vm2575_vm7 = vmor %vm528_vm8, %vm529_vm5 }
  0x6a   :  { %v708_v36 = vmul.f32 %v705_v6, %v2469_v3  ;;  %v527_v25 = vadd.f32 %v2476_v19, %v526_v48  ;;  %v217_v12 = vsub.f32 %v214_v31, %v2541_v39  ;;  %v274_v13 = vsub.f32 %v268_v27, %v271_v43 }
  0x6b   :  { %v534_v6 = vand.u32 2147483648, %v2379_v34  ;;  %v402_v4 = vmul.f32 -1.0, %v401_v20  ;;  %v921_v11 = vadd.f32 %v920_v58, %v919_v33  ;;  %v295_v23 = vadd.f32 %v2204_v60, %v2201_v59 }
  0x6c   :  { %v1852_v18 = vadd.f32 -0.3333295, %v708_v36  ;;  %v484_v34 = vsel %vm2564_vm2, %v453_v55, %v2326_v47  ;;  %v531_v14 = vsel %vm2575_vm7, %v2476_v19, %v527_v25  ;;  %vm533_vm8 = vcmp.eq.f32.partialorder %v532_v22, 8.507059e+37 }
  0x6d   :  { %v880_v44 = vand.u32 2147483647, %v2580_v35  ;;  %v2600_v9 = vadd.f32 1e-07, %v217_v12  ;;  %v2608_v60 = vsel %vm367_vm0, %v402_v4, %v484_v34  ;;  %v922_v2 = vrot.slane %v921_v11, 2  ;;  %v32_v4 = vld [vmem:[#allocation2 + $0x38] sm:$0xff] }
  0x6e   :  { %v714_v49 = vmul.f32 %v1852_v18, %v2469_v3  ;;  %v826_v3 = vor.u32 1.1754944e-38, %v825_v16  ;;  %v2623_v10 = vmul.f32 %v2608_v60, %v2608_v60  ;;  %v277_v29 = vmul.f32 %v274_v13, %v274_v13 }
  0x6f   :  { %1935 = vrcp.f32 %v2600_v9  ;;  %v846_v42 = vsub.f32 0.0, %v2066_v7  ;;  %vm72_vm3 = vweird.f32 %v2407_v40  ;;  %vm73_vm9 = vweird.f32 %v2498_v50 }
  0x70   :  { %v717_v51 = vmul.f32 %v714_v49, %v2454_v62  ;;  %v827_v15 = vsel %vm824_vm6, %v826_v3, %v822_v32  ;;  %v493_v20 = vmul.f32 0.080537446, %v2623_v10  ;;  %v283_v27 = vrot.slane %v277_v29, 1  ;;  %vm2666_vm12 = vmor %vm72_vm3, %vm73_vm9 }
  0x71   :  { %v2570_v1 = vmul.f32 %v827_v15, %v2447_v26  ;;  %v266_v26 = vsel %vm2533_vm10, %v2444_v24, %v261_v5  ;;  %v298_v24 = vsub.f32 %v295_v23, %v2338_v53  ;;  %v535_v5 = vor.u32 1.1754944e-38, %v534_v6 }
  0x72   :  { %v720_v56 = vadd.f32 %v717_v51, %v2454_v62  ;;  %v68_v53 = vmul.f32 %v2498_v50, %v2407_v40  ;;  %v2639_v49 = vsel %vm2564_vm2, 0.7853982, %v2031_v8  ;;  %v1838_v16 = vadd.f32 -0.13877685, %v493_v20 }
  0x73   :  { %v2611_v0 = vsub.f32 %v298_v24, %v2340_v54  ;;  %v536_v19 = vsel %vm533_vm8, %v535_v5, %v531_v14  ;;  %v2651_v51 = vrot.slane %v846_v42, 3  ;;  %v2655_v22 = vadd.f32 %v283_v27, %v277_v29 }
  0x74   :  { %v723_v57 = vadd.f32 %v720_v56, %v2487_v21  ;;  %v2604_v21 = vmul.f32 %v266_v26, %v2257_v46  ;;  %v2616_v38 = vmul.f32 %v536_v19, %v2352_v63  ;;  %v883_v46 = vsub.f32 0.0, %v880_v44 }
  0x75   :  { %v69_v31 = vsub.f32 1.0, %v68_v53  ;;  %v2632_v41 = vpop.eup %1935  ;;  %v76_v56 = vand.u32 2147483647, %v2407_v40  ;;  %v499_v61 = vmul.f32 %v1838_v16, %v2623_v10  ;;  %v78_v26 = vand.u32 2147483648, %v2407_v40 }
  0x76   :  { %v726_v17 = vsub.f32 %v522_v28, %v723_v57  ;;  %v923_v28 = vadd.f32 %v922_v2, %v921_v11  ;;  %v2628_v30 = vmax.f32 %v2616_v38, 1e-12  ;;  %v886_v18 = vmul.f32 1.442695, %v883_v46 }
  0x77   :  { %v70_v48 = vmul.f32 %v2498_v50, %v69_v31  ;;  %v2643_v52 = vmul.f32 %v2632_v41, %v2600_v9  ;;  %v2646_v45 = vadd.f32 1.0, %v2616_v38  ;;  %vm568_vm11 = vcmp.gt.f32.partialorder %v2616_v38, 2.4142137 }
  0x78   :  { %v729_v59 = vmul.f32 %v726_v17, %v726_v17  ;;  %1937 = vrcp.f32 %v2628_v30  ;;  %v924_v37 = vrot.slane %v923_v28, 1  ;;  %vm594_vm15 = vweird.f32 %v2628_v30 }
  0x79   :  { %v71_v55 = vadd.f32 %v2498_v50, %v70_v48  ;;  %v600_v62 = vand.u32 2147483648, %v2628_v30  ;;  %vm2683_vm6 = vcmp.eq.f32.partialorder %v76_v56, 8.507059e+37  ;;  %v137_v17 = vmul.f32 0.5, %v32_v4  ;;  %v34_v56 = vld [vmem:[#allocation2 + $0x48] sm:$0xff] }
  0x7a   :  { %v2613_v36 = vmul.f32 0.40528473, %v729_v59  ;;  %v2653_v3 = vadd.f32 %v924_v37, %v923_v28  ;;  %v598_v24 = vand.u32 2147483647, %v2628_v30  ;;  %v79_v5 = vor.u32 1.1754944e-38, %v78_v26 }
  0x7b   :  { %v75_v23 = vsel %vm2666_vm12, %v2498_v50, %v71_v55  ;;  %v601_v19 = vor.u32 1.1754944e-38, %v600_v62  ;;  %v649_v50 = vand.u32 2147483647, %v2646_v45  ;;  %v143_v53 = vrot.slane %v137_v17, 2 }
  0x7c   :  { %v735_v54 = vsub.f32 %v2613_v36, %v2604_v21  ;;  %v651_v29 = vand.u32 2147483648, %v2646_v45  ;;  %vm645_vm8 = vweird.f32 %v2646_v45  ;;  %vm599_vm9 = vcmp.eq.f32.partialorder %v598_v24, 8.507059e+37 }
  0x7d   :  { %v2707_v20 = vsub.f32 %v32_v4, %v143_v53  ;;  %v2709_v42 = vadd.f32 %v143_v53, %v32_v4  ;;  %v1844_v55 = vadd.f32 -1.0, %v2616_v38  ;;  %v2756_v24 = vadd.f32 1e-07, %v2655_v22 }
  0x7e   :  { %v738_v63 = vadd.f32 1.0000001, %v735_v54  ;;  %v2649_v7 = vpop.eup %1937 }
  0x7f   :  { %v590_v33 = vmul.f32 %v2649_v7, %v2628_v30  ;;  %vm595_vm5 = vweird.f32 %v2649_v7 }
  0x80   :  { %1939 = vrcp.f32 %v738_v63  ;;  %v778_v43 = vand.u32 2147483647, %v738_v63  ;;  %vm774_vm10 = vweird.f32 %v738_v63  ;;  %v780_v58 = vand.u32 2147483648, %v738_v63  ;;  %vm2699_vm7 = vmor %vm594_vm15, %vm595_vm5 }
  0x81   :  { %1941 = vpow2.f32 %v886_v18  ;;  %v591_v13 = vsub.f32 1.0, %v590_v33  ;;  %v110_v18 = vrot.slane %v32_v4, 2  ;;  %vm574_vm15 = vmxor %vm568_vm11, %vm2032_vm4  ;;  %v502_v4 = vadd.f32 0.19977711, %v499_v61 }
  0x82   :  { %1943 = vrcp.f32 %v2646_v45  ;;  %vm2670_vm14 = vcmp.eq.f32.partialorder %v778_v43, 8.507059e+37  ;;  %v781_v44 = vor.u32 1.1754944e-38, %v780_v58  ;;  %vm962_vm5 = vcmask 1040384  }
  0x83   :  { %v592_v11 = vmul.f32 %v2649_v7, %v591_v13 }
  0x85   :  { %v593_v2 = vadd.f32 %v2649_v7, %v592_v11 }
  0x86   :  { %v1940_v32 = vpop.eup %1939 }
  0x87   :  { %v770_v15 = vmul.f32 %v1940_v32, %v738_v63  ;;  %v1942_v6 = vpop.eup %1941  ;;  %vm775_vm1 = vweird.f32 %v1940_v32  ;;  %v80_v63 = vsel %vm2683_vm6, %v79_v5, %v75_v23  ;;  %v597_v48 = vsel %vm2699_vm7, %v2649_v7, %v593_v2 }
  0x88   :  { %v1944_v59 = vpop.eup %1943  ;;  %vm2689_vm2 = vmor %vm774_vm10, %vm775_vm1  ;;  %v98_v31 = vmul.f32 2.0, %v80_v63  ;;  %vm571_vm10 = vcmp.gt.f32.partialorder %v2616_v38, 0.41421357  ;;  %v602_v12 = vsel %vm599_vm9, %v601_v19, %v597_v48  ;;  %vm966_vm6 = vcmask 1041408  }
  0x89   :  { %v771_v57 = vsub.f32 1.0, %v770_v15  ;;  %v641_v28 = vmul.f32 %v1944_v59, %v2646_v45  ;;  %vm646_vm3 = vweird.f32 %v1944_v59  ;;  %v39_v45 = vld [vmem:[#allocation2 + $0x70] sm:$0xff]  ;;  %v652_v15 = vor.u32 1.1754944e-38, %v651_v29  ;;  %vm2748_vm1 = vmand %vm571_vm10, %vm574_vm15 }
  0x8a   :  { %v104_v16 = vmul.f32 %v98_v31, %v98_v31  ;;  %vm2726_vm12 = vmor %vm645_vm8, %vm646_vm3  ;;  %v1833_v26 = vadd.f32 -0.5, %v98_v31  ;;  %v934_v34 = vmul.f32 %v2653_v3, %v39_v45  ;;  %v603_v61 = vmul.f32 -1.0, %v602_v12 }
  0x8b   :  { %v772_v14 = vmul.f32 %v1940_v32, %v771_v57  ;;  %v642_v37 = vsub.f32 1.0, %v641_v28  ;;  %v892_v57 = vadd.f32 1.0, %v1942_v6  ;;  %v949_v22 = vrot.slane %v39_v45, 6 }
  0x8c   :  { %v116_v58 = vmul.f32 %v110_v18, %v104_v16  ;;  %v940_v53 = vrot.slane %v934_v34, 7  ;;  %v225_v63 = vsub.f32 1.0, %v2643_v52  ;;  %vm228_vm3 = vweird.f32 %v2600_v9 }
  0x8d   :  { %v773_v46 = vadd.f32 %v1940_v32, %v772_v14  ;;  %v643_v33 = vmul.f32 %v1944_v59, %v642_v37  ;;  %v858_v14 = vmul.f32 %v2651_v51, %v39_v45  ;;  %v304_v51 = vmul.f32 %v2611_v0, %v2611_v0 }
  0x8e   :  { %v119_v11 = vmul.f32 0.5, %v116_v58  ;;  %v226_v34 = vmul.f32 %v2632_v41, %v225_v63 }
  0x8f   :  { %v777_v30 = vsel %vm2689_vm2, %v1940_v32, %v773_v46  ;;  %v2723_v32 = vsub.f32 %v2709_v42, %v2707_v20  ;;  %v644_v13 = vadd.f32 %v1944_v59, %v643_v33  ;;  %vm970_vm2 = vcmask 1042432  }
  0x90   :  { %v782_v27 = vsel %vm2670_vm14, %v781_v44, %v777_v30  ;;  %vm2730_vm14 = vcmp.eq.f32.partialorder %v649_v50, 8.507059e+37 }
  0x91   :  { %v783_v43 = vmul.f32 %v782_v27, %v2613_v36  ;;  %v188_v62 = vadd.f32 1e-07, %v2723_v32  ;;  %v648_v17 = vsel %vm2726_vm12, %v1944_v59, %v644_v13  ;;  %v505_v59 = vmul.f32 %v502_v4, %v2623_v10 }
  0x92   :  { %v653_v6 = vsel %vm2730_vm14, %v652_v15, %v648_v17  ;;  %v382_v4 = vsel %vm367_vm0, 1.5707964, %v2639_v49  ;;  %vm229_vm0 = vweird.f32 %v2632_v41  ;;  %vm789_vm14 = vweird.f32 %v2756_v24 }
  0x93   :  { %v831_v25 = vmul.f32 %v783_v43, %v2613_v36  ;;  %v2743_v36 = vrot.slane %v188_v62, 1  ;;  %v654_v5 = vmul.f32 %v1844_v55, %v653_v6  ;;  %v1841_v31 = vadd.f32 -0.3333295, %v505_v59  ;;  %vm2825_vm12 = vmor %vm228_vm3, %vm229_vm0 }
  0x94   :  { %v310_v55 = vrot.slane %v304_v51, 1 }
  0x95   :  { %v834_v23 = vadd.f32 %v831_v25, %v2570_v1  ;;  %v125_v1 = vrot.slane %v119_v11, 2  ;;  %1945 = vrcp.f32 %v2743_v36  ;;  %vm342_vm7 = vweird.f32 %v2743_v36 }
  0x96   :  { %1947 = vlog2.f32 %v892_v57  ;;  %v348_v15 = vand.u32 2147483648, %v2743_v36  ;;  %v511_v25 = vmul.f32 %v1841_v31, %v2623_v10  ;;  %v346_v13 = vand.u32 2147483647, %v2743_v36 }
  0x97   :  { %v837_v3 = vsub.f32 %v2604_v21, %v834_v23  ;;  %v2762_v40 = vsub.f32 %v1833_v26, %v125_v1  ;;  %v2764_v2 = vadd.f32 %v1833_v26, %v125_v1  ;;  %v685_v21 = vsel %vm2748_vm1, %v654_v5, %v2616_v38 }
  0x98   :  { %v2771_v46 = vsel %vm568_vm11, %v603_v61, %v685_v21  ;;  %1949 = vrcp.f32 %v2756_v24  ;;  %v234_v57 = vand.u32 2147483648, %v2600_v9  ;;  %v871_v23 = vmax.f32 %v2580_v35, 0.0 }
  0x99   :  { %v840_v19 = vmax.f32 %v837_v3, 0.0  ;;  %v928_v50 = vsub.f32 1.0, %v837_v3  ;;  %v2775_v0 = vsub.f32 %v2764_v2, %v2762_v40  ;;  %v691_v29 = vmul.f32 %v2771_v46, %v2771_v46 }
  0x9a   :  { %v874_v10 = vmul.f32 %v34_v56, %v2580_v35  ;;  %v316_v61 = vadd.f32 %v310_v55, %v304_v51  ;;  %v349_v6 = vor.u32 1.1754944e-38, %v348_v15  ;;  %v514_v1 = vmul.f32 %v511_v25, %v2608_v60 }
  0x9b   :  { %v864_v54 = vrot.slane %v840_v19, 7  ;;  %v931_v28 = vmul.f32 %v928_v50, %v39_v45  ;;  %v182_v18 = vadd.f32 1e-07, %v2775_v0  ;;  %v1946_v30 = vpop.eup %1945  ;;  %v694_v48 = vmul.f32 0.080537446, %v691_v29 }
  0x9c   :  { %v338_v33 = vmul.f32 %v1946_v30, %v2743_v36  ;;  %vm343_vm8 = vweird.f32 %v1946_v30  ;;  %v1948_v62 = vpop.eup %1947  ;;  %vm347_vm10 = vcmp.eq.f32.partialorder %v346_v13, 8.507059e+37  ;;  %v232_v5 = vand.u32 2147483647, %v2600_v9 }
  0x9d   :  { %v870_v37 = vmul.f32 %v864_v54, %v858_v14  ;;  %v965_v27 = vsel %vm962_vm5, %v931_v28, %v940_v53  ;;  %v2784_v43 = vrot.slane %v182_v18, 1  ;;  %v1847_v52 = vadd.f32 -0.13877685, %v694_v48  ;;  %vm2805_vm9 = vmor %vm342_vm7, %vm343_vm8 }
  0x9e   :  { %v969_v16 = vsel %vm966_vm6, %v965_v27, %v949_v22  ;;  %v339_v7 = vsub.f32 1.0, %v338_v33  ;;  %v1950_v11 = vpop.eup %1949  ;;  %v235_v59 = vor.u32 1.1754944e-38, %v234_v57  ;;  %v877_v51 = vsub.f32 %v871_v23, %v874_v10 }
  0x9f   :  { %v958_v45 = vrot.slane %v870_v37, 6  ;;  %1951 = vrcp.f32 %v2784_v43  ;;  %v700_v12 = vmul.f32 %v1847_v52, %v691_v29  ;;  %v785_v47 = vmul.f32 %v1950_v11, %v2756_v24 }
  0xa0   :  { %v340_v26 = vmul.f32 %v1946_v30, %v339_v7  ;;  %v896_v53 = vmul.f32 0.6931472, %v1948_v62  ;;  %v227_v21 = vadd.f32 %v2632_v41, %v226_v34  ;;  %v319_v54 = vmul.f32 0.25, %v316_v61 }
  0xa1   :  { %v973_v58 = vsel %vm970_vm2, %v969_v16, %v958_v45  ;;  %v703_v17 = vadd.f32 0.19977711, %v700_v12  ;;  %v786_v19 = vsub.f32 1.0, %v785_v47  ;;  %v580_v28 = vsel %vm2748_vm1, 0.7853982, %v2031_v8 }
  0xa2   :  { %1887 = vmatmul.msk.f32.vlgmr.msra.gmra.mxu2 %vm904_vm13, %v973_v58  ;;  %v341_v49 = vadd.f32 %v1946_v30, %v340_v26  ;;  %v795_v27 = vand.u32 2147483648, %v2756_v24  ;;  %vm790_vm15 = vweird.f32 %v1950_v11  ;;  %v793_v16 = vand.u32 2147483647, %v2756_v24 }
  0xa3   :  { %v706_v35 = vmul.f32 %v703_v17, %v691_v29  ;;  %v787_v63 = vmul.f32 %v1950_v11, %v786_v19  ;;  %vm233_vm1 = vcmp.eq.f32.partialorder %v232_v5, 8.507059e+37  ;;  %vm791_vm7 = vmor %vm789_vm14, %vm790_vm15  ;;  %v901_v7 = vadd.f32 %v896_v53, %v877_v51 }
  0xa4   :  { %v345_v50 = vsel %vm2805_vm9, %v1946_v30, %v341_v49  ;;  %v517_v30 = vadd.f32 %v514_v1, %v2608_v60  ;;  %v796_v33 = vor.u32 1.1754944e-38, %v795_v27  ;;  %v231_v60 = vsel %vm2825_vm12, %v2632_v41, %v227_v21 }
  0xa5   :  { %v2812_v3 = vpop.eup %1951  ;;  %v1850_v22 = vadd.f32 -0.3333295, %v706_v35  ;;  %v350_v31 = vsel %vm347_vm10, %v349_v6, %v345_v50  ;;  %v788_v44 = vadd.f32 %v1950_v11, %v787_v63  ;;  %vm794_vm8 = vcmp.eq.f32.partialorder %v793_v16, 8.507059e+37 }
  0xa6   :  { %v539_v48 = vmul.f32 %v2812_v3, %v2784_v43  ;;  %v2837_v45 = vmul.f32 %v350_v31, %v2723_v32  ;;  %v520_v52 = vadd.f32 %v517_v30, %v382_v4  ;;  %v236_v25 = vsel %vm233_vm1, %v235_v59, %v231_v60 }
  0xa7   :  { %v712_v37 = vmul.f32 %v1850_v22, %v691_v29  ;;  %v583_v29 = vsel %vm568_vm11, 1.5707964, %v580_v28  ;;  %v792_v55 = vsel %vm791_vm7, %v1950_v11, %v788_v44  ;;  %v905_v38 = vsel %vm904_vm13, %v901_v7, 0.0 }
  0xa8   :  { %v797_v56 = vsel %vm794_vm8, %v796_v33, %v792_v55  ;;  %v540_v58 = vsub.f32 1.0, %v539_v48  ;;  %v386_v13 = vmax.f32 %v2837_v45, 1e-12  ;;  %v2849_v62 = vadd.f32 1.0, %v2837_v45 }
  0xa9   :  { %v715_v9 = vmul.f32 %v712_v37, %v2771_v46  ;;  %v2845_v15 = vmul.f32 %v797_v56, %v319_v54  ;;  %v2853_v57 = vmul.f32 %v236_v25, %v2541_v39  ;;  %v155_v26 = vmin.f32 %v2764_v2, %v2709_v42 }
  0xaa   :  { %1953 = vrcp.f32 %v386_v13  ;;  %v158_v11 = vmax.f32 %v2762_v40, %v2707_v20  ;;  %vm543_vm11 = vweird.f32 %v2784_v43  ;;  %vm544_vm3 = vweird.f32 %v2812_v3 }
  0xab   :  { %v718_v24 = vadd.f32 %v715_v9, %v2771_v46  ;;  %v541_v46 = vmul.f32 %v2812_v3, %v540_v58  ;;  %1955 = vrcp.f32 %v2849_v62  ;;  %v906_v23 = vrot.slane %v905_v38, 4  ;;  %vm2872_vm9 = vmor %vm543_vm11, %vm544_vm3 }
  0xac   :  { %v547_v39 = vand.u32 2147483647, %v2784_v43  ;;  %v549_v34 = vand.u32 2147483648, %v2784_v43  ;;  %v2870_v47 = vsub.f32 %v155_v26, %v158_v11  ;;  %v414_v51 = vand.u32 2147483648, %v386_v13  ;;  %v2949_v26 = vld [vmem:[#allocation2 + $0x20] sm:$0xff] }
  0xad   :  { %v721_v12 = vadd.f32 %v718_v24, %v583_v29  ;;  %v542_v17 = vadd.f32 %v2812_v3, %v541_v46  ;;  %v907_v5 = vadd.f32 %v906_v23, %v905_v38  ;;  %vm408_vm10 = vweird.f32 %v386_v13 }
  0xae   :  { %vm2880_vm0 = vcmp.eq.f32.partialorder %v547_v39, 8.507059e+37  ;;  %v550_v19 = vor.u32 1.1754944e-38, %v549_v34  ;;  %v164_v22 = vmax.f32 %v2870_v47, 0.0  ;;  %vm368_vm14 = vcmp.gt.f32.partialorder %v2837_v45, 2.4142137 }
  0xaf   :  { %v724_v41 = vsub.f32 %v520_v52, %v721_v12  ;;  %v546_v21 = vsel %vm2872_vm9, %v2812_v3, %v542_v17  ;;  %v412_v28 = vand.u32 2147483647, %v386_v13  ;;  %v908_v31 = vrot.slane %v907_v5, 2 }
  0xb0   :  { %v1954_v14 = vpop.eup %1953  ;;  %vm371_vm15 = vcmp.gt.f32.partialorder %v2837_v45, 0.41421357  ;;  %vm459_vm1 = vweird.f32 %v2849_v62  ;;  %v551_v18 = vsel %vm2880_vm0, %v550_v19, %v546_v21  ;;  %v269_v3 = vmax.f32 %v2764_v2, %v2709_v42  ;;  %v1973_v19 = vld [vmem:[#allocation2] sm:$0xff] }
  0xb1   :  { %v727_v4 = vmul.f32 %v724_v41, %v724_v41  ;;  %v404_v6 = vmul.f32 %v1954_v14, %v386_v13  ;;  %v2876_v1 = vpop.eup %1955  ;;  %vm409_vm12 = vweird.f32 %v1954_v14  ;;  %v415_v37 = vor.u32 1.1754944e-38, %v414_v51  ;;  %v37_v21 = vld [vmem:[#allocation2 + $0x60] sm:$0xff] }
  0xb2   :  { %v455_v53 = vmul.f32 %v2876_v1, %v2849_v62  ;;  %vm2898_vm7 = vmor %vm408_vm10, %vm409_vm12  ;;  %v463_v27 = vand.u32 2147483647, %v2849_v62  ;;  %v465_v48 = vand.u32 2147483648, %v2849_v62  ;;  %v272_v44 = vmin.f32 %v2762_v40, %v2707_v20 }
  0xb3   :  { %v2863_v10 = vmul.f32 0.40528473, %v727_v4  ;;  %v405_v50 = vsub.f32 1.0, %v404_v6  ;;  %v296_v16 = vadd.f32 %v2709_v42, %v2707_v20  ;;  %vm460_vm8 = vweird.f32 %v2876_v1  ;;  %vm374_vm10 = vmxor %vm368_vm14, %vm2032_vm4 }
  0xb4   :  { %v456_v63 = vsub.f32 1.0, %v455_v53  ;;  %vm2909_vm11 = vcmp.eq.f32.partialorder %v412_v28, 8.507059e+37  ;;  %v1836_v60 = vadd.f32 -1.0, %v2837_v45  ;;  %v2916_v55 = vmul.f32 %v551_v18, %v2775_v0  ;;  %vm2927_vm9 = vmor %vm459_vm1, %vm460_vm8 }
  0xb5   :  { %v733_v61 = vsub.f32 %v2863_v10, %v2853_v57  ;;  %v406_v54 = vmul.f32 %v1954_v14, %v405_v50  ;;  %v909_v24 = vadd.f32 %v908_v31, %v907_v5  ;;  %v2918_v56 = vsub.f32 %v269_v3, %v272_v44  ;;  %vm2960_vm1 = vmand %vm371_vm15, %vm374_vm10 }
  0xb6   :  { %v457_v29 = vmul.f32 %v2876_v1, %v456_v63  ;;  %v299_v20 = vsub.f32 %v296_v16, %v2762_v40  ;;  %vm2931_vm0 = vcmp.eq.f32.partialorder %v463_v27, 8.507059e+37  ;;  %v466_v12 = vor.u32 1.1754944e-38, %v465_v48 }
  0xb7   :  { %v2878_v35 = vadd.f32 1.0000001, %v733_v61  ;;  %v407_v9 = vadd.f32 %v1954_v14, %v406_v54  ;;  %v2947_v4 = vmax.f32 %v2916_v55, 1e-12  ;;  %v200_v11 = vmul.f32 %v2784_v43, %v2775_v0 }
  0xb8   :  { %v2937_v13 = vsub.f32 %v299_v20, %v2764_v2  ;;  %v458_v41 = vadd.f32 %v2876_v1, %v457_v29  ;;  %v170_v2 = vrot.slane %v164_v22, 1  ;;  %v212_v23 = vmul.f32 %v2743_v36, %v2723_v32 }
  0xb9   :  { %1957 = vrcp.f32 %v2878_v35  ;;  %v411_v42 = vsel %vm2898_vm7, %v1954_v14, %v407_v9  ;;  %vm744_vm3 = vweird.f32 %v2878_v35  ;;  %v750_v40 = vand.u32 2147483648, %v2878_v35 }
  0xba   :  { %v416_v62 = vsel %vm2909_vm11, %v415_v37, %v411_v42  ;;  %v748_v46 = vand.u32 2147483647, %v2878_v35  ;;  %v462_v39 = vsel %vm2927_vm9, %v2876_v1, %v458_v41  ;;  %v910_v32 = vrot.slane %v909_v24, 1 }
  0xbb   :  { %v417_v14 = vmul.f32 -1.0, %v416_v62  ;;  %v467_v61 = vsel %vm2931_vm0, %v466_v12, %v462_v39  ;;  %v751_v0 = vor.u32 1.1754944e-38, %v750_v40  ;;  %v881_v43 = vand.u32 2147483647, %v2949_v26 }
  0xbc   :  { %v468_v36 = vmul.f32 %v1836_v60, %v467_v61  ;;  %vm749_vm8 = vcmp.eq.f32.partialorder %v748_v46, 8.507059e+37  ;;  %1959 = vrcp.f32 %v2947_v4  ;;  %v2970_v49 = vmul.f32 %v170_v2, %v164_v22 }
  0xbd   :  { %v215_v6 = vadd.f32 %v212_v23, %v200_v11  ;;  %v844_v50 = vsub.f32 0.0, %v1973_v19  ;;  %v911_v51 = vadd.f32 %v910_v32, %v909_v24  ;;  %v884_v53 = vsub.f32 0.0, %v881_v43 }
  0xbe   :  { %v485_v1 = vsel %vm2960_vm1, %v468_v36, %v2837_v45  ;;  %v638_v22 = vadd.f32 1.0, %v2916_v55  ;;  %vm609_vm15 = vweird.f32 %v2947_v4  ;;  %v278_v58 = vmul.f32 %v2918_v56, %v2918_v56 }
  0xbf   :  { %v1958_v52 = vpop.eup %1957  ;;  %v218_v28 = vsub.f32 %v215_v6, %v2970_v49  ;;  %v850_v3 = vrot.slane %v844_v50, 3  ;;  %v932_v30 = vmul.f32 %v911_v51, %v37_v21  ;;  %v888_v27 = vmul.f32 1.442695, %v884_v53 }
  0xc0   :  { %v740_v7 = vmul.f32 %v1958_v52, %v2878_v35  ;;  %vm745_vm12 = vweird.f32 %v1958_v52  ;;  %v2977_v35 = vsel %vm368_vm14, %v417_v14, %v485_v1  ;;  %1961 = vrcp.f32 %v638_v22 }
  0xc1   :  { %vm746_vm7 = vmor %vm744_vm3, %vm745_vm12  ;;  %v2984_v63 = vmul.f32 %v2977_v35, %v2977_v35  ;;  %v2989_v44 = vadd.f32 1e-07, %v218_v28  ;;  %v856_v60 = vmul.f32 %v850_v3, %v37_v21  ;;  %v938_v29 = vrot.slane %v932_v30, 7 }
  0xc2   :  { %v741_v38 = vsub.f32 1.0, %v740_v7  ;;  %v1960_v31 = vpop.eup %1959  ;;  %vm569_vm3 = vcmp.gt.f32.partialorder %v2916_v55, 2.4142137  ;;  %v666_v46 = vand.u32 2147483648, %v638_v22  ;;  %vm660_vm0 = vweird.f32 %v638_v22 }
  0xc3   :  { %v605_v37 = vmul.f32 %v1960_v31, %v2947_v4  ;;  %v494_v16 = vmul.f32 0.080537446, %v2984_v63  ;;  %vm610_vm11 = vweird.f32 %v1960_v31  ;;  %v664_v11 = vand.u32 2147483647, %v638_v22 }
  0xc4   :  { %v742_v34 = vmul.f32 %v1958_v52, %v741_v38  ;;  %vm3001_vm9 = vmor %vm609_vm15, %vm610_vm11  ;;  %1963 = vrcp.f32 %v2989_v44  ;;  %v667_v36 = vor.u32 1.1754944e-38, %v666_v46 }
  0xc5   :  { %v606_v9 = vsub.f32 1.0, %v605_v37  ;;  %vm575_vm15 = vmxor %vm569_vm3, %vm2032_vm4  ;;  %vm665_vm11 = vcmp.eq.f32.partialorder %v664_v11, 8.507059e+37  ;;  %1965 = vpow2.f32 %v888_v27  ;;  %v305_v27 = vmul.f32 %v2937_v13, %v2937_v13 }
  0xc6   :  { %v743_v47 = vadd.f32 %v1958_v52, %v742_v34  ;;  %v1962_v20 = vpop.eup %1961  ;;  %v284_v34 = vrot.slane %v278_v58, 1  ;;  %vm243_vm4 = vweird.f32 %v2989_v44 }
  0xc7   :  { %v607_v24 = vmul.f32 %v1960_v31, %v606_v9  ;;  %v656_v40 = vmul.f32 %v1962_v20, %v638_v22  ;;  %vm661_vm10 = vweird.f32 %v1962_v20 }
  0xc8   :  { %v747_v5 = vsel %vm746_vm7, %v1958_v52, %v743_v47  ;;  %v947_v52 = vrot.slane %v37_v21, 6  ;;  %vm572_vm7 = vcmp.gt.f32.partialorder %v2916_v55, 0.41421357  ;;  %v1845_v47 = vadd.f32 -1.0, %v2916_v55 }
  0xc9   :  { %v752_v59 = vsel %vm749_vm8, %v751_v0, %v747_v5  ;;  %v608_v25 = vadd.f32 %v1960_v31, %v607_v24  ;;  %v657_v2 = vsub.f32 1.0, %v656_v40  ;;  %vm3012_vm8 = vmor %vm660_vm0, %vm661_vm10  ;;  %v290_v5 = vadd.f32 %v284_v34, %v278_v58 }
  0xca   :  { %v753_v54 = vmul.f32 %v752_v59, %v2863_v10 }
  0xcb   :  { %v612_v39 = vsel %vm3001_vm9, %v1960_v31, %v608_v25  ;;  %v658_v61 = vmul.f32 %v1962_v20, %v657_v2  ;;  %vm3024_vm9 = vmand %vm572_vm7, %vm575_vm15  ;;  %v293_v22 = vadd.f32 1e-07, %v290_v5  ;;  %v380_v25 = vsel %vm2960_vm1, 0.7853982, %v2031_v8 }
  0xcc   :  { %v829_v18 = vmul.f32 %v753_v54, %v2863_v10  ;;  %v615_v10 = vand.u32 2147483648, %v2947_v4  ;;  %v3028_v54 = vpop.eup %1963  ;;  %v383_v17 = vsel %vm368_vm14, 1.5707964, %v380_v25  ;;  %v581_v11 = vsel %vm3024_vm9, 0.7853982, %v2031_v8 }
  0xcd   :  { %v659_v6 = vadd.f32 %v1962_v20, %v658_v61  ;;  %v1966_v3 = vpop.eup %1965  ;;  %v239_v37 = vmul.f32 %v3028_v54, %v2989_v44  ;;  %1967 = vrcp.f32 %v293_v22  ;;  %vm244_vm0 = vweird.f32 %v3028_v54 }
  0xce   :  { %v832_v48 = vadd.f32 %v829_v18, %v2845_v15  ;;  %v613_v15 = vand.u32 2147483647, %v2947_v4  ;;  %v616_v38 = vor.u32 1.1754944e-38, %v615_v10  ;;  %v893_v9 = vadd.f32 1.0, %v1966_v3  ;;  %vm3061_vm1 = vmor %vm243_vm4, %vm244_vm0 }
  0xcf   :  { %v663_v19 = vsel %vm3012_vm8, %v1962_v20, %v659_v6  ;;  %v872_v20 = vmax.f32 %v2949_v26, 0.0  ;;  %v810_v34 = vand.u32 2147483648, %v293_v22  ;;  %vm804_vm10 = vweird.f32 %v293_v22 }
  0xd0   :  { %v835_v33 = vsub.f32 %v2853_v57, %v832_v48  ;;  %v1839_v57 = vadd.f32 -0.13877685, %v494_v16  ;;  %vm614_vm12 = vcmp.eq.f32.partialorder %v613_v15, 8.507059e+37  ;;  %v668_v53 = vsel %vm665_vm11, %v667_v36, %v663_v19 }
  0xd1   :  { %v617_v43 = vsel %vm614_vm12, %v616_v38, %v612_v39  ;;  %1969 = vlog2.f32 %v893_v9  ;;  %v808_v45 = vand.u32 2147483647, %v293_v22  ;;  %v811_v8 = vor.u32 1.1754944e-38, %v810_v34 }
  0xd2   :  { %v838_v42 = vmax.f32 %v835_v33, 0.0  ;;  %v926_v7 = vsub.f32 1.0, %v835_v33  ;;  %v500_v14 = vmul.f32 %v1839_v57, %v2984_v63  ;;  %v618_v51 = vmul.f32 -1.0, %v617_v43  ;;  %v35_v33 = vld [vmem:[#allocation2 + $0x50] sm:$0xff] }
  0xd3   :  { %vm809_vm8 = vcmp.eq.f32.partialorder %v808_v45, 8.507059e+37 }
  0xd4   :  { %v862_v62 = vrot.slane %v838_v42, 7  ;;  %v929_v41 = vmul.f32 %v926_v7, %v37_v21  ;;  %v503_v59 = vadd.f32 0.19977711, %v500_v14  ;;  %v669_v21 = vmul.f32 %v1845_v47, %v668_v53  ;;  %v1968_v7 = vpop.eup %1967 }
  0xd5   :  { %v875_v42 = vmul.f32 %v35_v33, %v2949_v26  ;;  %v800_v58 = vmul.f32 %v1968_v7, %v293_v22  ;;  %v247_v26 = vand.u32 2147483647, %v2989_v44  ;;  %vm805_vm12 = vweird.f32 %v1968_v7 }
  0xd6   :  { %v868_v23 = vmul.f32 %v862_v62, %v856_v60  ;;  %v963_v56 = vsel %vm962_vm5, %v929_v41, %v938_v29  ;;  %v506_v28 = vmul.f32 %v503_v59, %v2984_v63  ;;  %v686_v31 = vsel %vm3024_vm9, %v669_v21, %v2916_v55  ;;  %vm806_vm7 = vmor %vm804_vm10, %vm805_vm12 }
  0xd7   :  { %v967_v4 = vsel %vm966_vm6, %v963_v56, %v947_v52  ;;  %v689_v18 = vsel %vm569_vm3, %v618_v51, %v686_v31  ;;  %v240_v60 = vsub.f32 1.0, %v239_v37  ;;  %v311_v29 = vrot.slane %v305_v27, 1  ;;  %v1970_v46 = vpop.eup %1969 }
  0xd8   :  { %v956_v0 = vrot.slane %v868_v23, 6  ;;  %v692_v30 = vmul.f32 %v689_v18, %v689_v18  ;;  %v1842_v48 = vadd.f32 -0.3333295, %v506_v28  ;;  %v801_v62 = vsub.f32 1.0, %v800_v58 }
  0xd9   :  { %v241_v13 = vmul.f32 %v3028_v54, %v240_v60  ;;  %v317_v57 = vadd.f32 %v311_v29, %v305_v27  ;;  %v249_v41 = vand.u32 2147483648, %v2989_v44  ;;  %vm248_vm14 = vcmp.eq.f32.partialorder %v247_v26, 8.507059e+37 }
  0xda   :  { %v971_v1 = vsel %vm970_vm2, %v967_v4, %v956_v0  ;;  %v695_v16 = vmul.f32 0.080537446, %v692_v30  ;;  %v512_v52 = vmul.f32 %v1842_v48, %v2984_v63  ;;  %v878_v63 = vsub.f32 %v872_v20, %v875_v42  ;;  %v1974_v20 = vld [vmem:[#allocation2 + $0x8] sm:$0xff] }
  0xdb   :  { %1868 = vmatmul.msk.f32.vlgmr.msra.gmra.mxu0 %vm904_vm13, %v971_v1  ;;  %v242_v2 = vadd.f32 %v3028_v54, %v241_v13  ;;  %v802_v23 = vmul.f32 %v1968_v7, %v801_v62  ;;  %v320_v56 = vmul.f32 0.25, %v317_v57  ;;  %v898_v0 = vmul.f32 0.6931472, %v1970_v46 }
  0xdc   :  { %v1848_v10 = vadd.f32 -0.13877685, %v695_v16  ;;  %v515_v12 = vmul.f32 %v512_v52, %v2977_v35  ;;  %v250_v36 = vor.u32 1.1754944e-38, %v249_v41  ;;  %v845_v42 = vsub.f32 0.0, %v1974_v20 }
  0xdd   :  { %v803_v61 = vadd.f32 %v1968_v7, %v802_v23  ;;  %v246_v44 = vsel %vm3061_vm1, %v3028_v54, %v242_v2  ;;  %v902_v19 = vadd.f32 %v898_v0, %v878_v63 }
  0xde   :  { %v701_v24 = vmul.f32 %v1848_v10, %v692_v30  ;;  %v518_v39 = vadd.f32 %v515_v12, %v2977_v35  ;;  %v584_v35 = vsel %vm569_vm3, 1.5707964, %v581_v11  ;;  %v251_v50 = vsel %vm248_vm14, %v250_v36, %v246_v44 }
  0xdf   :  { %v807_v43 = vsel %vm806_vm7, %v1968_v7, %v803_v61  ;;  %v252_v53 = vmul.f32 %v251_v50, %v2970_v49  ;;  %v912_v55 = vsel %vm904_vm13, %v902_v19, 0.0  ;;  %v851_v57 = vrot.slane %v845_v42, 3 }
  0xe0   :  { %v704_v15 = vadd.f32 0.19977711, %v701_v24  ;;  %v521_v47 = vadd.f32 %v518_v39, %v383_v17  ;;  %v812_v1 = vsel %vm809_vm8, %v811_v8, %v807_v43  ;;  %v913_v28 = vrot.slane %v912_v55, 4 }
  0xe1   :  { %v813_v5 = vmul.f32 %v812_v1, %v320_v56 }
  0xe2   :  { %v707_v40 = vmul.f32 %v704_v15, %v692_v30  ;;  %v38_v15 = vld [vmem:[#allocation2 + $0x68] sm:$0xff] }
  0xe3   :  { %v857_v63 = vmul.f32 %v851_v57, %v38_v15  ;;  %v948_v41 = vrot.slane %v38_v15, 6 }
  0xe4   :  { %v1851_v38 = vadd.f32 -0.3333295, %v707_v40 }
  0xe6   :  { %v713_v4 = vmul.f32 %v1851_v38, %v692_v30  ;;  %v914_v30 = vadd.f32 %v913_v28, %v912_v55 }
  0xe8   :  { %v716_v32 = vmul.f32 %v713_v4, %v689_v18  ;;  %v915_v54 = vrot.slane %v914_v30, 2 }
  0xea   :  { %v719_v6 = vadd.f32 %v716_v32, %v689_v18  ;;  %v916_v48 = vadd.f32 %v915_v54, %v914_v30 }
  0xec   :  { %v722_v59 = vadd.f32 %v719_v6, %v584_v35  ;;  %v917_v60 = vrot.slane %v916_v48, 1 }
  0xee   :  { %v725_v51 = vsub.f32 %v521_v47, %v722_v59  ;;  %v918_v7 = vadd.f32 %v917_v60, %v916_v48 }
  0xf0   :  { %v728_v21 = vmul.f32 %v725_v51, %v725_v51  ;;  %v933_v25 = vmul.f32 %v918_v7, %v38_v15 }
  0xf2   :  { %v731_v22 = vmul.f32 0.40528473, %v728_v21  ;;  %v939_v26 = vrot.slane %v933_v25, 7 }
  0xf4   :  { %v734_v31 = vsub.f32 %v731_v22, %v252_v53 }
  0xf6   :  { %v737_v3 = vadd.f32 1.0000001, %v734_v31 }
  0xf8   :  { %1971 = vrcp.f32 %v737_v3  ;;  %v765_v27 = vand.u32 2147483648, %v737_v3  ;;  %vm759_vm3 = vweird.f32 %v737_v3  ;;  %v763_v9 = vand.u32 2147483647, %v737_v3 }
  0xfa   :  { %v766_v49 = vor.u32 1.1754944e-38, %v765_v27  ;;  %vm764_vm9 = vcmp.eq.f32.partialorder %v763_v9, 8.507059e+37 }
  0xfe   :  { %v1972_v37 = vpop.eup %1971 }
  0xff   :  { %v755_v18 = vmul.f32 %v1972_v37, %v737_v3  ;;  %vm760_vm15 = vweird.f32 %v1972_v37 }
 0x100   :  { %vm761_vm11 = vmor %vm759_vm3, %vm760_vm15 }
 0x101   :  { %v756_v16 = vsub.f32 1.0, %v755_v18 }
 0x103   :  { %v757_v33 = vmul.f32 %v1972_v37, %v756_v16 }
 0x105   :  { %v758_v10 = vadd.f32 %v1972_v37, %v757_v33 }
 0x107   :  { %v762_v29 = vsel %vm761_vm11, %v1972_v37, %v758_v10 }
 0x108   :  { %v767_v52 = vsel %vm764_vm9, %v766_v49, %v762_v29 }
 0x109   :  { %v768_v24 = vmul.f32 %v767_v52, %v731_v22 }
 0x10b   :  { %v830_v13 = vmul.f32 %v768_v24, %v731_v22 }
 0x10d   :  { %v833_v58 = vadd.f32 %v830_v13, %v813_v5 }
 0x10f   :  { %v836_v12 = vsub.f32 %v252_v53, %v833_v58 }
 0x111   :  { %v839_v40 = vmax.f32 %v836_v12, 0.0  ;;  %v927_v62 = vsub.f32 1.0, %v836_v12 }
 0x113   :  { %v863_v38 = vrot.slane %v839_v40, 7  ;;  %v930_v46 = vmul.f32 %v927_v62, %v38_v15 }
 0x115   :  { %v869_v2 = vmul.f32 %v863_v38, %v857_v63  ;;  %v964_v17 = vsel %vm962_vm5, %v930_v46, %v939_v26 }
 0x116   :  { %v968_v11 = vsel %vm966_vm6, %v964_v17, %v948_v41 }
 0x117   :  { %v957_v23 = vrot.slane %v869_v2, 6 }
 0x119   :  { %v972_v56 = vsel %vm970_vm2, %v968_v11, %v957_v23 }
 0x11a   :  { %1884 = vmatmul.msk.f32.vlgmr.msra.gmra.mxu1 %vm904_vm13, %v972_v56 }
 0x125   :  { %v1808_v34 = vpop.f32.mrf.mxu2 }
 0x158   :  { %v1768_v39 = vpop.f32.mrf.mxu0 }
 0x197   :  { %v1788_v4 = vpop.f32.mrf.mxu1 }
 0x198   :  { %v1789_v14 = vadd.f32 %v1788_v4, %v1768_v39 }
 0x19a   :  { %v1809_v61 = vadd.f32 %v1808_v34, %v1789_v14 }
 0x19c   :  { %1811 = vst [vmem:[#allocation5] sm:$0xff] %v1809_v61 }
 0x19d   :  { %1822 = dma.vmem_to_hbm [thread:$0]  %s1818_s13, 128, %s1820_s16, [#allocation4]  }
 0x19e   :  { %2025 = dma.done.wait [#allocation4], 128  }
 0x19f   :  { %2026 = vsyncadd [#allocation4], 4294967168 }
 0x1a0   :  { %1827 = vsyncpa [#allocation3], 1 }
 0x1a1   :  { %1828 = vsyncpa [#allocation4], 1 }

</bundles_post_ra>
